<compile_context>
chip_gen: v7x
topology: tpu7x:2x2x1
jax: 0.10.0
libtpu: 0.0.40
codegen_flags: <defaults>
</compile_context>

<pallas_src>
import functools

import jax
import jax.numpy as jnp
import numpy as np
from jax.experimental import pallas as pl
from jax.experimental.pallas import tpu as pltpu

LN_EPS = 1e-5          # PyTorch LayerNorm default eps
NEG_INF = -1e30        # finite mask sentinel (avoids exp(-inf - -inf) NaN)


def _layernorm(x, g, b):
    mu = jnp.mean(x, axis=-1, keepdims=True)
    xc = x - mu
    var = jnp.mean(xc * xc, axis=-1, keepdims=True)
    return xc * jax.lax.rsqrt(var + LN_EPS) * g + b


# ------------------------------------------------------------------- kernel ---


def _fused_forward_kernel(x_ref, kpad_ref,
                          wqkv_ref, bqkv_ref, wo_ref, bo_ref,
                          w1_ref, b1_ref, w2_ref, b2_ref,
                          ln1g_ref, ln1b_ref, ln2g_ref, ln2b_ref,
                          fng_ref, fnb_ref, wf_ref, bf_ref,
                          out_ref,
                          xf_ref, ctx_ref,
                          *, nhead, batch, n_layers):
    """One grid step = one encoder layer (steps < L) or one vocab tile (steps >= L).

    x_ref:    (B*S, D) f32 embeddings (token + position), read at step 0 only
    kpad_ref: (B, 1, S) f32 additive key-padding vector (0 or NEG_INF)
    per-layer weights: leading (L, ...) axis squeezed away by the BlockSpec,
                       matmul weights in bf16, biases/LN params in f32
    wf_ref:   (D, TV) bf16 vocab-projection tile,  bf_ref: (1, TV) f32
    out_ref:  (B*S, TV) f32 logits tile (lane-dense, TV multiple of 128)
    xf_ref:   (B*S, D) f32 VMEM scratch — residual stream carried across steps
    ctx_ref:  (B*S, D) bf16 VMEM scratch — concatenated attention heads
    """
    step = pl.program_id(0)
    BS, D = xf_ref.shape
    B = batch
    S = BS // B
    H = nhead
    Dh = D // H
    scale = 1.0 / float(np.sqrt(Dh))

    def mm(a_f32, w_bf16, bias_f32):
        # bf16 operands, f32 accumulate on the MXU; bias add in f32.
        return jnp.dot(a_f32.astype(jnp.bfloat16), w_bf16,
                       preferred_element_type=jnp.float32) + bias_f32

    # ---- step 0: load embeddings into the persistent residual scratch --------
    @pl.when(step == 0)
    def _():
        xf_ref[...] = x_ref[...]

    # ---- steps 0..L-1: one encoder layer per grid step -----------------------
    @pl.when(step < n_layers)
    def _():
        xf = xf_ref[...]                                     # (BS, D) f32

        # Additive attention mask rebuilt per step: causal (iota) + key padding.
        # (VPU filler — cheaper than holding a (B,S,S) slab across the grid.)
        rows = jax.lax.broadcasted_iota(jnp.int32, (S, S), 0)
        cols = jax.lax.broadcasted_iota(jnp.int32, (S, S), 1)
        causal = jnp.where(cols > rows, NEG_INF, 0.0).astype(jnp.float32)
        mask = causal[None, :, :] + kpad_ref[...]            # (B, S, S)

        # ----- self attention (post-LN, PyTorch TransformerEncoderLayer) -----
        qkv = mm(xf, wqkv_ref[...], bqkv_ref[...])           # (BS, 3D)
        q = qkv[:, 0 * D:1 * D].reshape(B, S, D)
        k = qkv[:, 1 * D:2 * D].reshape(B, S, D)
        v = qkv[:, 2 * D:3 * D].reshape(B, S, D)

        # TODO(synk): at production S, switch to flash-style k-tiling (online
        # softmax) instead of full (B,S,S) score rows; at production Dh>=128,
        # batch the heads into one einsum instead of this per-head unroll.
        for h in range(H):                                   # static unroll, H small
            sl = slice(h * Dh, (h + 1) * Dh)
            qh = q[:, :, sl].astype(jnp.bfloat16)            # (B, S, Dh)
            kh = k[:, :, sl].astype(jnp.bfloat16)
            vh = v[:, :, sl].astype(jnp.bfloat16)
            s = jnp.einsum('bqd,bkd->bqk', qh, kh,
                           preferred_element_type=jnp.float32) * scale + mask
            m = jnp.max(s, axis=-1, keepdims=True)
            p = jnp.exp(s - m)
            p = p * pl.reciprocal(jnp.sum(p, axis=-1, keepdims=True), approx=True)
            ctx_h = jnp.einsum('bqk,bkd->bqd', p.astype(jnp.bfloat16), vh,
                               preferred_element_type=jnp.float32)   # (B, S, Dh)
            # "Concat" = adjacent lane-group writes into the shared ctx buffer.
            ctx_ref[:, sl] = ctx_h.reshape(BS, Dh).astype(jnp.bfloat16)

        # ONE full-K output projection for all heads (full MXU contraction).
        attn = jnp.dot(ctx_ref[...], wo_ref[...],
                       preferred_element_type=jnp.float32) + bo_ref[...]
        x1 = _layernorm(xf + attn, ln1g_ref[...], ln1b_ref[...])

        # ----- feed forward (relu) -----
        h1 = jnp.maximum(mm(x1, w1_ref[...], b1_ref[...]), 0.0)
        h2 = mm(h1, w2_ref[...], b2_ref[...])
        x2 = _layernorm(x1 + h2, ln2g_ref[...], ln2b_ref[...])

        # On the last layer step also apply the final encoder LayerNorm so the
        # vocab-projection phase only has to do the matmul.
        xn = _layernorm(x2, fng_ref[...], fnb_ref[...])
        xf_ref[...] = jnp.where(step == n_layers - 1, xn, x2)

    # ---- steps L..L+NV-1: vocab projection, one lane-dense V tile per step ---
    @pl.when(step >= n_layers)
    def _():
        # TODO(synk): for v7x, optionally emit bf16 logits to halve writeback.
        out_ref[...] = mm(xf_ref[...], wf_ref[...], bf_ref[...])


# ------------------------------------------------------------------ wrapper ---


def _vmem_limit_bytes(B, S, D, FF, V, TV, H):
    """Rough resident-VMEM estimate (double-buffered weights + activations)."""
    bs = B * S
    per_layer_w = 2 * (D * 3 * D + D * D + D * FF + FF * D)       # bf16 weights
    per_layer_v = 4 * (3 * D + 5 * D + FF)                        # f32 biases + LN
    resident = 4 * bs * D * 2 + 4 * B * S + 4 * 2 * D             # x, xf scratch, kpad, final LN
    ctx = 2 * bs * D                                              # bf16 head buffer
    vtile = 2 * D * TV + 4 * TV + 4 * bs * TV                     # wf/bf/out tiles
    act = 4 * (bs * 3 * D + H * B * S * S + bs * FF + 4 * bs * D)
    est = 2 * (per_layer_w + per_layer_v) + resident + ctx + 2 * vtile + act
    try:
        phys = pltpu.get_tpu_info().vmem_capacity_bytes
    except Exception:
        phys = 64 * 1024 * 1024                                   # v7x floor
    return int(min(max(2 * est, 16 * 1024 * 1024), 3 * phys // 4))


def _const_spec(shape):
    n = len(shape)
    return pl.BlockSpec(shape, lambda i, _n=n: (0,) * _n)


def dialogue_transformer_forward(x_tok, params, cfg):
    B, S = x_tok.shape
    D, V = cfg['d_model'], cfg['vocab_size']
    L, FF, H = cfg['num_layers'], cfg['dim_feedforward'], cfg['nhead']
    BS = B * S

    # Vocab tile width: lane-dense multiple of 128 when possible.
    # TODO(synk): sweep TV in 512..2048 (and pipeline_mode=pl.Buffered) at
    # production V per chip generation.
    TV = 128 if V % 128 == 0 else V
    NV = V // TV
    n_steps = L + NV

    # Glue: embedding gathers (no matmul hot path) + position embedding broadcast.
    emb = (params['vocab_emb'][x_tok]
           + params['pos_emb'][jnp.arange(S)][None, :, :]).astype(jnp.float32)
    emb_flat = emb.reshape(BS, D)
    # Glue: additive key-padding vector (B,1,S); causal part is built in-kernel.
    key_pad = jnp.where(x_tok == cfg['pad_token_id'], NEG_INF,
                        0.0).astype(jnp.float32).reshape(B, 1, S)

    bf16 = jnp.bfloat16

    # Per-layer stacked weights: squeezed leading dim, streamed one layer per step
    # (clamped to the last layer during the vocab phase so no extra DMA happens).
    def layer_spec(shape_tail):
        return pl.BlockSpec((None,) + shape_tail,
                            lambda i: (jnp.minimum(i, L - 1), 0, 0))

    # Vocab-projection tiles: column tile v = step - L (clamped to 0 during layers).
    def vtile_spec(shape):
        return pl.BlockSpec(shape, lambda i: (0, jnp.maximum(i - L, 0)))

    in_specs = [
        _const_spec((BS, D)),            # embeddings
        _const_spec((B, 1, S)),          # key-padding additive vector
        layer_spec((D, 3 * D)), layer_spec((1, 3 * D)),
        layer_spec((D, D)), layer_spec((1, D)),
        layer_spec((D, FF)), layer_spec((1, FF)),
        layer_spec((FF, D)), layer_spec((1, D)),
        layer_spec((1, D)), layer_spec((1, D)),
        layer_spec((1, D)), layer_spec((1, D)),
        _const_spec((1, D)), _const_spec((1, D)),
        vtile_spec((D, TV)), vtile_spec((1, TV)),
    ]

    kernel = functools.partial(_fused_forward_kernel,
                               nhead=H, batch=B, n_layers=L)

    # TODO(synk): for v7x (2 TensorCores), add a "parallel" grid axis over
    # B*S row tiles for the dense matmuls once shapes are production-sized.
    out = pl.pallas_call(
        kernel,
        grid=(n_steps,),
        in_specs=in_specs,
        out_specs=vtile_spec((BS, TV)),
        out_shape=jax.ShapeDtypeStruct((BS, V), jnp.float32),
        scratch_shapes=[pltpu.VMEM((BS, D), jnp.float32),     # residual stream
                        pltpu.VMEM((BS, D), jnp.bfloat16)],   # head-context buffer
        compiler_params=pltpu.CompilerParams(
            dimension_semantics=("arbitrary",),
            vmem_limit_bytes=_vmem_limit_bytes(B, S, D, FF, V, TV, H)),
    )(
        emb_flat, key_pad,
        params['wqkv_t'].astype(bf16), params['bqkv'],
        params['wo_t'].astype(bf16), params['bo'],
        params['w1_t'].astype(bf16), params['b1'],
        params['w2_t'].astype(bf16), params['b2'],
        params['ln1_g'], params['ln1_b'], params['ln2_g'], params['ln2_b'],
        params['final_ln_g'], params['final_ln_b'],
        params['wf_t'].astype(bf16), params['bf'],
    )
    return out.reshape(B, S, V)


# ---------------------------------------------------------- pure-JAX reference


def reference_forward(x_tok, params, cfg):
    B, S = x_tok.shape
    D, H = cfg['d_model'], cfg['nhead']
    Dh = D // H
    emb = (params['vocab_emb'][x_tok]
           + params['pos_emb'][jnp.arange(S)][None, :, :]).astype(jnp.float32)
    rows = jnp.arange(S)
    causal = jnp.where(rows[None, :] > rows[:, None], NEG_INF, 0.0).astype(jnp.float32)
    key_pad = jnp.where(x_tok == cfg['pad_token_id'], NEG_INF, 0.0).astype(jnp.float32)
    mask = causal[None, :, :] + key_pad[:, None, :]
    h = emb
    for l in range(cfg['num_layers']):
        qkv = jnp.einsum('bsd,de->bse', h, params['wqkv_t'][l]) + params['bqkv'][l]
        q, k, v = qkv[..., :D], qkv[..., D:2 * D], qkv[..., 2 * D:]
        outs = []
        for hh in range(H):
            sl = slice(hh * Dh, (hh + 1) * Dh)
            s = jnp.einsum('bqd,bkd->bqk', q[..., sl], k[..., sl]) / np.sqrt(Dh) + mask
            p = jax.nn.softmax(s, axis=-1)
            outs.append(jnp.einsum('bqk,bkd->bqd', p, v[..., sl]))
        ctx = jnp.concatenate(outs, axis=-1)
        attn = jnp.einsum('bsd,de->bse', ctx, params['wo_t'][l]) + params['bo'][l]
        x1 = _layernorm(h + attn, params['ln1_g'][l], params['ln1_b'][l])
        f1 = jax.nn.relu(jnp.einsum('bsd,df->bsf', x1, params['w1_t'][l]) + params['b1'][l])
        f2 = jnp.einsum('bsf,fd->bsd', f1, params['w2_t'][l]) + params['b2'][l]
        h = _layernorm(x1 + f2, params['ln2_g'][l], params['ln2_b'][l])
    h = _layernorm(h, params['final_ln_g'], params['final_ln_b'])
    return jnp.einsum('bsd,dv->bsv', h, params['wf_t']) + params['bf']


# -------------------------------------------------------------------- params --


def init_params(key, cfg):
    V, S, D, FF, L = (cfg['vocab_size'], cfg['seq_len'], cfg['d_model'],
                      cfg['dim_feedforward'], cfg['num_layers'])
    keys = jax.random.split(key, 7)
    std = 0.02

    def rnd(k, shape):
        return std * jax.random.normal(k, shape, jnp.float32)

    return {
        'vocab_emb': rnd(keys[0], (V, D)),
        'pos_emb': rnd(keys[1], (S, D)),
        'wf_t': rnd(keys[2], (D, V)),                 # feature_embedding weight, transposed
        'bf': jnp.zeros((1, V), jnp.float32),
        'final_ln_g': jnp.ones((1, D), jnp.float32),
        'final_ln_b': jnp.zeros((1, D), jnp.float32),
        # per-layer weights stacked on a leading (L, ...) axis for the layer grid
        'wqkv_t': rnd(keys[3], (L, D, 3 * D)),        # in_proj_weight, transposed
        'bqkv': jnp.zeros((L, 1, 3 * D), jnp.float32),
        'wo_t': rnd(keys[4], (L, D, D)),              # out_proj weight, transposed
        'bo': jnp.zeros((L, 1, D), jnp.float32),
        'w1_t': rnd(keys[5], (L, D, FF)),             # linear1 weight, transposed
        'b1': jnp.zeros((L, 1, FF), jnp.float32),
        'w2_t': rnd(keys[6], (L, FF, D)),             # linear2 weight, transposed
        'b2': jnp.zeros((L, 1, D), jnp.float32),
        'ln1_g': jnp.ones((L, 1, D), jnp.float32),
        'ln1_b': jnp.zeros((L, 1, D), jnp.float32),
        'ln2_g': jnp.ones((L, 1, D), jnp.float32),
        'ln2_b': jnp.zeros((L, 1, D), jnp.float32),
    }


# ---------------------------------------------------------------------- main --


if __name__ == "__main__":
    cfg = dict(vocab_size=256, seq_len=8, pad_token_id=0,
               d_model=32, nhead=4, num_layers=2, dim_feedforward=64)
    B, S = 2, cfg['seq_len']

    key = jax.random.PRNGKey(0)
    k_params, k_tok = jax.random.split(key)
    params = init_params(k_params, cfg)

    # tokens in [1, vocab): deterministic; plus one pad token to exercise the mask.
    x_tok = jax.random.randint(k_tok, (B, S), 1, cfg['vocab_size'], dtype=jnp.int32)
    x_tok = x_tok.at[0, S - 1].set(cfg['pad_token_id'])

    out = jax.block_until_ready(dialogue_transformer_forward(x_tok, params, cfg))

    assert out.shape == (B, S, cfg['vocab_size']), out.shape
    assert bool(jnp.all(jnp.isfinite(out)))

    ref = jax.block_until_ready(reference_forward(x_tok, params, cfg))
    # kernel uses bf16 MXU operands with f32 accumulation; reference is pure f32.
    np.testing.assert_allclose(np.asarray(out), np.asarray(ref), rtol=2e-2, atol=5e-3)

    print("KERNEL_OK")
</pallas_src>

<mosaic_0001>
module attributes {stable_mosaic.version = 11 : i64} {
  func.func @_fused_forward_kernel(%arg0: i32, %arg1: memref<16x32xf32, #tpu.memory_space<vmem>>, %arg2: memref<2x1x8xf32, #tpu.memory_space<vmem>>, %arg3: memref<1x32x96xbf16, #tpu.memory_space<vmem>>, %arg4: memref<1x1x96xf32, #tpu.memory_space<vmem>>, %arg5: memref<1x32x32xbf16, #tpu.memory_space<vmem>>, %arg6: memref<1x1x32xf32, #tpu.memory_space<vmem>>, %arg7: memref<1x32x64xbf16, #tpu.memory_space<vmem>>, %arg8: memref<1x1x64xf32, #tpu.memory_space<vmem>>, %arg9: memref<1x64x32xbf16, #tpu.memory_space<vmem>>, %arg10: memref<1x1x32xf32, #tpu.memory_space<vmem>>, %arg11: memref<1x1x32xf32, #tpu.memory_space<vmem>>, %arg12: memref<1x1x32xf32, #tpu.memory_space<vmem>>, %arg13: memref<1x1x32xf32, #tpu.memory_space<vmem>>, %arg14: memref<1x1x32xf32, #tpu.memory_space<vmem>>, %arg15: memref<1x32xf32, #tpu.memory_space<vmem>>, %arg16: memref<1x32xf32, #tpu.memory_space<vmem>>, %arg17: memref<32x128xbf16, #tpu.memory_space<vmem>>, %arg18: memref<1x128xf32, #tpu.memory_space<vmem>>, %arg19: memref<16x128xf32, #tpu.memory_space<vmem>>, %arg20: memref<16x32xf32, #tpu.memory_space<vmem>>, %arg21: memref<16x32xbf16, #tpu.memory_space<vmem>>) attributes {dimension_semantics = [#tpu.dimension_semantics<arbitrary>], iteration_bounds = array<i64: 4>, scalar_prefetch = 0 : i64, scratch_operands = 2 : i64, tpu.core_type = #tpu.core_type<tc>, window_params = [{pipeline_mode = #tpu.pipeline_mode<synchronous>, transform_indices = @transform_0, window_bounds = array<i64: 16, 32>}, {pipeline_mode = #tpu.pipeline_mode<synchronous>, transform_indices = @transform_1, window_bounds = array<i64: 2, 1, 8>}, {transform_indices = @transform_2, window_bounds = array<i64: 1, 32, 96>}, {transform_indices = @transform_3, window_bounds = array<i64: 1, 1, 96>}, {transform_indices = @transform_4, window_bounds = array<i64: 1, 32, 32>}, {transform_indices = @transform_5, window_bounds = array<i64: 1, 1, 32>}, {transform_indices = @transform_6, window_bounds = array<i64: 1, 32, 64>}, {transform_indices = @transform_7, window_bounds = array<i64: 1, 1, 64>}, {transform_indices = @transform_8, window_bounds = array<i64: 1, 64, 32>}, {transform_indices = @transform_9, window_bounds = array<i64: 1, 1, 32>}, {transform_indices = @transform_10, window_bounds = array<i64: 1, 1, 32>}, {transform_indices = @transform_11, window_bounds = array<i64: 1, 1, 32>}, {transform_indices = @transform_12, window_bounds = array<i64: 1, 1, 32>}, {transform_indices = @transform_13, window_bounds = array<i64: 1, 1, 32>}, {pipeline_mode = #tpu.pipeline_mode<synchronous>, transform_indices = @transform_14, window_bounds = array<i64: 1, 32>}, {pipeline_mode = #tpu.pipeline_mode<synchronous>, transform_indices = @transform_15, window_bounds = array<i64: 1, 32>}, {transform_indices = @transform_16, window_bounds = array<i64: 32, 128>}, {transform_indices = @transform_17, window_bounds = array<i64: 1, 128>}, {transform_indices = @transform_18, window_bounds = array<i64: 16, 128>}]} {
    %c0_i32 = arith.constant 0 : i32
    %0 = arith.cmpi eq, %arg0, %c0_i32 : i32
    %1 = arith.extui %0 : i1 to i32
    %c0_i32_0 = arith.constant 0 : i32
    %2 = arith.cmpi ne, %1, %c0_i32_0 : i32
    scf.if %2 {
      %c0 = arith.constant 0 : index
      %c0_4 = arith.constant 0 : index
      %9 = vector.load %arg1[%c0, %c0_4] : memref<16x32xf32, #tpu.memory_space<vmem>>, vector<16x32xf32>
      %c0_5 = arith.constant 0 : index
      %c0_6 = arith.constant 0 : index
      %10 = vector.load %arg20[%c0_5, %c0_6] : memref<16x32xf32, #tpu.memory_space<vmem>>, vector<16x32xf32>
      tpu.vector_store %arg20[%c0_5, %c0_6], %9 {strides = array<i32>} : memref<16x32xf32, #tpu.memory_space<vmem>>, vector<16x32xf32>,
    } else {
    }
    %c2_i32 = arith.constant 2 : i32
    %3 = arith.cmpi slt, %arg0, %c2_i32 : i32
    %4 = arith.extui %3 : i1 to i32
    %c0_i32_1 = arith.constant 0 : i32
    %5 = arith.cmpi ne, %4, %c0_i32_1 : i32
    scf.if %5 {
      %c0 = arith.constant 0 : index
      %c0_4 = arith.constant 0 : index
      %9 = vector.load %arg20[%c0, %c0_4] : memref<16x32xf32, #tpu.memory_space<vmem>>, vector<16x32xf32>
      %10 = tpu.iota {dimensions = array<i32: 0>} : vector<8x8xi32>
      %11 = tpu.iota {dimensions = array<i32: 1>} : vector<8x8xi32>
      %12 = arith.cmpi sgt, %11, %10 : vector<8x8xi32>
      %cst = arith.constant -1.000000e+30 : f32
      %cst_5 = arith.constant 0.000000e+00 : f32
      %13 = vector.broadcast %cst : f32 to vector<8x8xf32>
      %14 = vector.broadcast %cst_5 : f32 to vector<8x8xf32>
      %15 = arith.select %12, %13, %14 : vector<8x8xi1>, vector<8x8xf32>
      %16 = vector.shape_cast %15 : vector<8x8xf32> to vector<1x8x8xf32>
      %c0_6 = arith.constant 0 : index
      %c0_7 = arith.constant 0 : index
      %c0_8 = arith.constant 0 : index
      %17 = vector.load %arg2[%c0_6, %c0_7, %c0_8] : memref<2x1x8xf32, #tpu.memory_space<vmem>>, vector<2x1x8xf32>
      %18 = vector.broadcast %16 : vector<1x8x8xf32> to vector<2x8x8xf32>
      %19 = vector.broadcast %17 : vector<2x1x8xf32> to vector<2x8x8xf32>
      %20 = arith.addf %18, %19 : vector<2x8x8xf32>
      %c0_9 = arith.constant 0 : index
      %c0_10 = arith.constant 0 : index
      %c0_11 = arith.constant 0 : index
      %21 = vector.load %arg3[%c0_9, %c0_10, %c0_11] : memref<1x32x96xbf16, #tpu.memory_space<vmem>>, vector<1x32x96xbf16>
      %22 = vector.shape_cast %21 : vector<1x32x96xbf16> to vector<32x96xbf16>
      %c0_12 = arith.constant 0 : index
      %c0_13 = arith.constant 0 : index
      %c0_14 = arith.constant 0 : index
      %23 = vector.load %arg4[%c0_12, %c0_13, %c0_14] : memref<1x1x96xf32, #tpu.memory_space<vmem>>, vector<1x1x96xf32>
      %24 = vector.shape_cast %23 : vector<1x1x96xf32> to vector<1x96xf32>
      %25 = arith.truncf %9 : vector<16x32xf32> to vector<16x32xbf16>
      %cst_15 = arith.constant dense<0.000000e+00> : vector<16x96xf32>
      %26 = tpu.matmul %25, %22, %cst_15 {dimension_numbers = #tpu.dot_dimension_numbers<[1], [0], [0], [1], [0, 0, 1, 1], [], []>} : vector<16x32xbf16>, vector<32x96xbf16>, vector<16x96xf32> -> vector<16x96xf32>
      %27 = vector.broadcast %24 : vector<1x96xf32> to vector<16x96xf32>
      %28 = arith.addf %26, %27 : vector<16x96xf32>
      %29 = vector.extract_strided_slice %28 {offsets = [0, 0], sizes = [16, 32], strides = [1, 1]} : vector<16x96xf32> to vector<16x32xf32>
      %30 = vector.shape_cast %29 : vector<16x32xf32> to vector<2x8x32xf32>
      %31 = vector.extract_strided_slice %28 {offsets = [0, 32], sizes = [16, 32], strides = [1, 1]} : vector<16x96xf32> to vector<16x32xf32>
      %32 = vector.shape_cast %31 : vector<16x32xf32> to vector<2x8x32xf32>
      %33 = vector.extract_strided_slice %28 {offsets = [0, 64], sizes = [16, 32], strides = [1, 1]} : vector<16x96xf32> to vector<16x32xf32>
      %34 = vector.shape_cast %33 : vector<16x32xf32> to vector<2x8x32xf32>
      %35 = vector.extract_strided_slice %30 {offsets = [0, 0, 0], sizes = [2, 8, 8], strides = [1, 1, 1]} : vector<2x8x32xf32> to vector<2x8x8xf32>
      %36 = arith.truncf %35 : vector<2x8x8xf32> to vector<2x8x8xbf16>
      %37 = vector.extract_strided_slice %32 {offsets = [0, 0, 0], sizes = [2, 8, 8], strides = [1, 1, 1]} : vector<2x8x32xf32> to vector<2x8x8xf32>
      %38 = arith.truncf %37 : vector<2x8x8xf32> to vector<2x8x8xbf16>
      %39 = vector.extract_strided_slice %34 {offsets = [0, 0, 0], sizes = [2, 8, 8], strides = [1, 1, 1]} : vector<2x8x32xf32> to vector<2x8x8xf32>
      %40 = arith.truncf %39 : vector<2x8x8xf32> to vector<2x8x8xbf16>
      "tpu.trace_start"() <{level = 10 : i32, message = "bqd,bkd->bqk"}> : () -> ()
      %cst_16 = arith.constant dense<0.000000e+00> : vector<2x8x8xf32>
      %41 = tpu.matmul %36, %38, %cst_16 {dimension_numbers = #tpu.dot_dimension_numbers<[2], [2], [1], [1], [0, 0, 0, 1, 1, 1], [0], [0]>} : vector<2x8x8xbf16>, vector<2x8x8xbf16>, vector<2x8x8xf32> -> vector<2x8x8xf32>
      "tpu.trace_stop"() : () -> ()
      %cst_17 = arith.constant 0.353553385 : f32
      %42 = vector.broadcast %cst_17 : f32 to vector<2x8x8xf32>
      %43 = arith.mulf %41, %42 : vector<2x8x8xf32>
      %44 = arith.addf %43, %20 : vector<2x8x8xf32>
      %cst_18 = arith.constant dense<0xFF800000> : vector<2x8xf32>
      %45 = vector.multi_reduction <maximumf>, %44, %cst_18 [2] : vector<2x8x8xf32> to vector<2x8xf32>
      %46 = vector.shape_cast %45 : vector<2x8xf32> to vector<2x8x1xf32>
      %47 = vector.broadcast %46 : vector<2x8x1xf32> to vector<2x8x8xf32>
      %48 = arith.subf %44, %47 : vector<2x8x8xf32>
      %49 = math.exp %48 : vector<2x8x8xf32>
      %cst_19 = arith.constant dense<0.000000e+00> : vector<2x8xf32>
      %50 = vector.multi_reduction <add>, %49, %cst_19 [2] : vector<2x8x8xf32> to vector<2x8xf32>
      %51 = vector.shape_cast %50 : vector<2x8xf32> to vector<2x8x1xf32>
      %52 = tpu.reciprocal %51 {approx = true} : vector<2x8x1xf32> -> vector<2x8x1xf32>
      %53 = vector.broadcast %52 : vector<2x8x1xf32> to vector<2x8x8xf32>
      %54 = arith.mulf %49, %53 : vector<2x8x8xf32>
      %55 = arith.truncf %54 : vector<2x8x8xf32> to vector<2x8x8xbf16>
      "tpu.trace_start"() <{level = 10 : i32, message = "bqk,bkd->bqd"}> : () -> ()
      %cst_20 = arith.constant dense<0.000000e+00> : vector<2x8x8xf32>
      %56 = tpu.matmul %55, %40, %cst_20 {dimension_numbers = #tpu.dot_dimension_numbers<[2], [1], [1], [2], [0, 0, 0, 1, 1, 2], [0], [0]>} : vector<2x8x8xbf16>, vector<2x8x8xbf16>, vector<2x8x8xf32> -> vector<2x8x8xf32>
      "tpu.trace_stop"() : () -> ()
      %57 = vector.shape_cast %56 : vector<2x8x8xf32> to vector<16x8xf32>
      %58 = arith.truncf %57 : vector<16x8xf32> to vector<16x8xbf16>
      %c0_21 = arith.constant 0 : index
      %c0_22 = arith.constant 0 : index
      %59 = vector.load %arg21[%c0_21, %c0_22] : memref<16x32xbf16, #tpu.memory_space<vmem>>, vector<16x8xbf16>
      tpu.vector_store %arg21[%c0_21, %c0_22], %58 {strides = array<i32>} : memref<16x32xbf16, #tpu.memory_space<vmem>>, vector<16x8xbf16>,
      %60 = vector.extract_strided_slice %30 {offsets = [0, 0, 8], sizes = [2, 8, 8], strides = [1, 1, 1]} : vector<2x8x32xf32> to vector<2x8x8xf32>
      %61 = arith.truncf %60 : vector<2x8x8xf32> to vector<2x8x8xbf16>
      %62 = vector.extract_strided_slice %32 {offsets = [0, 0, 8], sizes = [2, 8, 8], strides = [1, 1, 1]} : vector<2x8x32xf32> to vector<2x8x8xf32>
      %63 = arith.truncf %62 : vector<2x8x8xf32> to vector<2x8x8xbf16>
      %64 = vector.extract_strided_slice %34 {offsets = [0, 0, 8], sizes = [2, 8, 8], strides = [1, 1, 1]} : vector<2x8x32xf32> to vector<2x8x8xf32>
      %65 = arith.truncf %64 : vector<2x8x8xf32> to vector<2x8x8xbf16>
      "tpu.trace_start"() <{level = 10 : i32, message = "bqd,bkd->bqk"}> : () -> ()
      %cst_23 = arith.constant dense<0.000000e+00> : vector<2x8x8xf32>
      %66 = tpu.matmul %61, %63, %cst_23 {dimension_numbers = #tpu.dot_dimension_numbers<[2], [2], [1], [1], [0, 0, 0, 1, 1, 1], [0], [0]>} : vector<2x8x8xbf16>, vector<2x8x8xbf16>, vector<2x8x8xf32> -> vector<2x8x8xf32>
      "tpu.trace_stop"() : () -> ()
      %cst_24 = arith.constant 0.353553385 : f32
      %67 = vector.broadcast %cst_24 : f32 to vector<2x8x8xf32>
      %68 = arith.mulf %66, %67 : vector<2x8x8xf32>
      %69 = arith.addf %68, %20 : vector<2x8x8xf32>
      %cst_25 = arith.constant dense<0xFF800000> : vector<2x8xf32>
      %70 = vector.multi_reduction <maximumf>, %69, %cst_25 [2] : vector<2x8x8xf32> to vector<2x8xf32>
      %71 = vector.shape_cast %70 : vector<2x8xf32> to vector<2x8x1xf32>
      %72 = vector.broadcast %71 : vector<2x8x1xf32> to vector<2x8x8xf32>
      %73 = arith.subf %69, %72 : vector<2x8x8xf32>
      %74 = math.exp %73 : vector<2x8x8xf32>
      %cst_26 = arith.constant dense<0.000000e+00> : vector<2x8xf32>
      %75 = vector.multi_reduction <add>, %74, %cst_26 [2] : vector<2x8x8xf32> to vector<2x8xf32>
      %76 = vector.shape_cast %75 : vector<2x8xf32> to vector<2x8x1xf32>
      %77 = tpu.reciprocal %76 {approx = true} : vector<2x8x1xf32> -> vector<2x8x1xf32>
      %78 = vector.broadcast %77 : vector<2x8x1xf32> to vector<2x8x8xf32>
      %79 = arith.mulf %74, %78 : vector<2x8x8xf32>
      %80 = arith.truncf %79 : vector<2x8x8xf32> to vector<2x8x8xbf16>
      "tpu.trace_start"() <{level = 10 : i32, message = "bqk,bkd->bqd"}> : () -> ()
      %cst_27 = arith.constant dense<0.000000e+00> : vector<2x8x8xf32>
      %81 = tpu.matmul %80, %65, %cst_27 {dimension_numbers = #tpu.dot_dimension_numbers<[2], [1], [1], [2], [0, 0, 0, 1, 1, 2], [0], [0]>} : vector<2x8x8xbf16>, vector<2x8x8xbf16>, vector<2x8x8xf32> -> vector<2x8x8xf32>
      "tpu.trace_stop"() : () -> ()
      %82 = vector.shape_cast %81 : vector<2x8x8xf32> to vector<16x8xf32>
      %83 = arith.truncf %82 : vector<16x8xf32> to vector<16x8xbf16>
      %c0_28 = arith.constant 0 : index
      %c8 = arith.constant 8 : index
      %84 = vector.load %arg21[%c0_28, %c8] : memref<16x32xbf16, #tpu.memory_space<vmem>>, vector<16x8xbf16>
      tpu.vector_store %arg21[%c0_28, %c8], %83 {strides = array<i32>} : memref<16x32xbf16, #tpu.memory_space<vmem>>, vector<16x8xbf16>,
      %85 = vector.extract_strided_slice %30 {offsets = [0, 0, 16], sizes = [2, 8, 8], strides = [1, 1, 1]} : vector<2x8x32xf32> to vector<2x8x8xf32>
      %86 = arith.truncf %85 : vector<2x8x8xf32> to vector<2x8x8xbf16>
      %87 = vector.extract_strided_slice %32 {offsets = [0, 0, 16], sizes = [2, 8, 8], strides = [1, 1, 1]} : vector<2x8x32xf32> to vector<2x8x8xf32>
      %88 = arith.truncf %87 : vector<2x8x8xf32> to vector<2x8x8xbf16>
      %89 = vector.extract_strided_slice %34 {offsets = [0, 0, 16], sizes = [2, 8, 8], strides = [1, 1, 1]} : vector<2x8x32xf32> to vector<2x8x8xf32>
      %90 = arith.truncf %89 : vector<2x8x8xf32> to vector<2x8x8xbf16>
      "tpu.trace_start"() <{level = 10 : i32, message = "bqd,bkd->bqk"}> : () -> ()
      %cst_29 = arith.constant dense<0.000000e+00> : vector<2x8x8xf32>
      %91 = tpu.matmul %86, %88, %cst_29 {dimension_numbers = #tpu.dot_dimension_numbers<[2], [2], [1], [1], [0, 0, 0, 1, 1, 1], [0], [0]>} : vector<2x8x8xbf16>, vector<2x8x8xbf16>, vector<2x8x8xf32> -> vector<2x8x8xf32>
      "tpu.trace_stop"() : () -> ()
      %cst_30 = arith.constant 0.353553385 : f32
      %92 = vector.broadcast %cst_30 : f32 to vector<2x8x8xf32>
      %93 = arith.mulf %91, %92 : vector<2x8x8xf32>
      %94 = arith.addf %93, %20 : vector<2x8x8xf32>
      %cst_31 = arith.constant dense<0xFF800000> : vector<2x8xf32>
      %95 = vector.multi_reduction <maximumf>, %94, %cst_31 [2] : vector<2x8x8xf32> to vector<2x8xf32>
      %96 = vector.shape_cast %95 : vector<2x8xf32> to vector<2x8x1xf32>
      %97 = vector.broadcast %96 : vector<2x8x1xf32> to vector<2x8x8xf32>
      %98 = arith.subf %94, %97 : vector<2x8x8xf32>
      %99 = math.exp %98 : vector<2x8x8xf32>
      %cst_32 = arith.constant dense<0.000000e+00> : vector<2x8xf32>
      %100 = vector.multi_reduction <add>, %99, %cst_32 [2] : vector<2x8x8xf32> to vector<2x8xf32>
      %101 = vector.shape_cast %100 : vector<2x8xf32> to vector<2x8x1xf32>
      %102 = tpu.reciprocal %101 {approx = true} : vector<2x8x1xf32> -> vector<2x8x1xf32>
      %103 = vector.broadcast %102 : vector<2x8x1xf32> to vector<2x8x8xf32>
      %104 = arith.mulf %99, %103 : vector<2x8x8xf32>
      %105 = arith.truncf %104 : vector<2x8x8xf32> to vector<2x8x8xbf16>
      "tpu.trace_start"() <{level = 10 : i32, message = "bqk,bkd->bqd"}> : () -> ()
      %cst_33 = arith.constant dense<0.000000e+00> : vector<2x8x8xf32>
      %106 = tpu.matmul %105, %90, %cst_33 {dimension_numbers = #tpu.dot_dimension_numbers<[2], [1], [1], [2], [0, 0, 0, 1, 1, 2], [0], [0]>} : vector<2x8x8xbf16>, vector<2x8x8xbf16>, vector<2x8x8xf32> -> vector<2x8x8xf32>
      "tpu.trace_stop"() : () -> ()
      %107 = vector.shape_cast %106 : vector<2x8x8xf32> to vector<16x8xf32>
      %108 = arith.truncf %107 : vector<16x8xf32> to vector<16x8xbf16>
      %c0_34 = arith.constant 0 : index
      %c16 = arith.constant 16 : index
      %109 = vector.load %arg21[%c0_34, %c16] : memref<16x32xbf16, #tpu.memory_space<vmem>>, vector<16x8xbf16>
      tpu.vector_store %arg21[%c0_34, %c16], %108 {strides = array<i32>} : memref<16x32xbf16, #tpu.memory_space<vmem>>, vector<16x8xbf16>,
      %110 = vector.extract_strided_slice %30 {offsets = [0, 0, 24], sizes = [2, 8, 8], strides = [1, 1, 1]} : vector<2x8x32xf32> to vector<2x8x8xf32>
      %111 = arith.truncf %110 : vector<2x8x8xf32> to vector<2x8x8xbf16>
      %112 = vector.extract_strided_slice %32 {offsets = [0, 0, 24], sizes = [2, 8, 8], strides = [1, 1, 1]} : vector<2x8x32xf32> to vector<2x8x8xf32>
      %113 = arith.truncf %112 : vector<2x8x8xf32> to vector<2x8x8xbf16>
      %114 = vector.extract_strided_slice %34 {offsets = [0, 0, 24], sizes = [2, 8, 8], strides = [1, 1, 1]} : vector<2x8x32xf32> to vector<2x8x8xf32>
      %115 = arith.truncf %114 : vector<2x8x8xf32> to vector<2x8x8xbf16>
      "tpu.trace_start"() <{level = 10 : i32, message = "bqd,bkd->bqk"}> : () -> ()
      %cst_35 = arith.constant dense<0.000000e+00> : vector<2x8x8xf32>
      %116 = tpu.matmul %111, %113, %cst_35 {dimension_numbers = #tpu.dot_dimension_numbers<[2], [2], [1], [1], [0, 0, 0, 1, 1, 1], [0], [0]>} : vector<2x8x8xbf16>, vector<2x8x8xbf16>, vector<2x8x8xf32> -> vector<2x8x8xf32>
      "tpu.trace_stop"() : () -> ()
      %cst_36 = arith.constant 0.353553385 : f32
      %117 = vector.broadcast %cst_36 : f32 to vector<2x8x8xf32>
      %118 = arith.mulf %116, %117 : vector<2x8x8xf32>
      %119 = arith.addf %118, %20 : vector<2x8x8xf32>
      %cst_37 = arith.constant dense<0xFF800000> : vector<2x8xf32>
      %120 = vector.multi_reduction <maximumf>, %119, %cst_37 [2] : vector<2x8x8xf32> to vector<2x8xf32>
      %121 = vector.shape_cast %120 : vector<2x8xf32> to vector<2x8x1xf32>
      %122 = vector.broadcast %121 : vector<2x8x1xf32> to vector<2x8x8xf32>
      %123 = arith.subf %119, %122 : vector<2x8x8xf32>
      %124 = math.exp %123 : vector<2x8x8xf32>
      %cst_38 = arith.constant dense<0.000000e+00> : vector<2x8xf32>
      %125 = vector.multi_reduction <add>, %124, %cst_38 [2] : vector<2x8x8xf32> to vector<2x8xf32>
      %126 = vector.shape_cast %125 : vector<2x8xf32> to vector<2x8x1xf32>
      %127 = tpu.reciprocal %126 {approx = true} : vector<2x8x1xf32> -> vector<2x8x1xf32>
      %128 = vector.broadcast %127 : vector<2x8x1xf32> to vector<2x8x8xf32>
      %129 = arith.mulf %124, %128 : vector<2x8x8xf32>
      %130 = arith.truncf %129 : vector<2x8x8xf32> to vector<2x8x8xbf16>
      "tpu.trace_start"() <{level = 10 : i32, message = "bqk,bkd->bqd"}> : () -> ()
      %cst_39 = arith.constant dense<0.000000e+00> : vector<2x8x8xf32>
      %131 = tpu.matmul %130, %115, %cst_39 {dimension_numbers = #tpu.dot_dimension_numbers<[2], [1], [1], [2], [0, 0, 0, 1, 1, 2], [0], [0]>} : vector<2x8x8xbf16>, vector<2x8x8xbf16>, vector<2x8x8xf32> -> vector<2x8x8xf32>
      "tpu.trace_stop"() : () -> ()
      %132 = vector.shape_cast %131 : vector<2x8x8xf32> to vector<16x8xf32>
      %133 = arith.truncf %132 : vector<16x8xf32> to vector<16x8xbf16>
      %c0_40 = arith.constant 0 : index
      %c24 = arith.constant 24 : index
      %134 = vector.load %arg21[%c0_40, %c24] : memref<16x32xbf16, #tpu.memory_space<vmem>>, vector<16x8xbf16>
      tpu.vector_store %arg21[%c0_40, %c24], %133 {strides = array<i32>} : memref<16x32xbf16, #tpu.memory_space<vmem>>, vector<16x8xbf16>,
      %c0_41 = arith.constant 0 : index
      %c0_42 = arith.constant 0 : index
      %135 = vector.load %arg21[%c0_41, %c0_42] : memref<16x32xbf16, #tpu.memory_space<vmem>>, vector<16x32xbf16>
      %c0_43 = arith.constant 0 : index
      %c0_44 = arith.constant 0 : index
      %c0_45 = arith.constant 0 : index
      %136 = vector.load %arg5[%c0_43, %c0_44, %c0_45] : memref<1x32x32xbf16, #tpu.memory_space<vmem>>, vector<1x32x32xbf16>
      %137 = vector.shape_cast %136 : vector<1x32x32xbf16> to vector<32x32xbf16>
      %cst_46 = arith.constant dense<0.000000e+00> : vector<16x32xf32>
      %138 = tpu.matmul %135, %137, %cst_46 {dimension_numbers = #tpu.dot_dimension_numbers<[1], [0], [0], [1], [0, 0, 1, 1], [], []>} : vector<16x32xbf16>, vector<32x32xbf16>, vector<16x32xf32> -> vector<16x32xf32>
      %c0_47 = arith.constant 0 : index
      %c0_48 = arith.constant 0 : index
      %c0_49 = arith.constant 0 : index
      %139 = vector.load %arg6[%c0_47, %c0_48, %c0_49] : memref<1x1x32xf32, #tpu.memory_space<vmem>>, vector<1x1x32xf32>
      %140 = vector.shape_cast %139 : vector<1x1x32xf32> to vector<1x32xf32>
      %141 = vector.broadcast %140 : vector<1x32xf32> to vector<16x32xf32>
      %142 = arith.addf %138, %141 : vector<16x32xf32>
      %143 = arith.addf %9, %142 : vector<16x32xf32>
      %c0_50 = arith.constant 0 : index
      %c0_51 = arith.constant 0 : index
      %c0_52 = arith.constant 0 : index
      %144 = vector.load %arg11[%c0_50, %c0_51, %c0_52] : memref<1x1x32xf32, #tpu.memory_space<vmem>>, vector<1x1x32xf32>
      %145 = vector.shape_cast %144 : vector<1x1x32xf32> to vector<1x32xf32>
      %c0_53 = arith.constant 0 : index
      %c0_54 = arith.constant 0 : index
      %c0_55 = arith.constant 0 : index
      %146 = vector.load %arg12[%c0_53, %c0_54, %c0_55] : memref<1x1x32xf32, #tpu.memory_space<vmem>>, vector<1x1x32xf32>
      %147 = vector.shape_cast %146 : vector<1x1x32xf32> to vector<1x32xf32>
      %cst_56 = arith.constant dense<0.000000e+00> : vector<16xf32>
      %148 = vector.multi_reduction <add>, %143, %cst_56 [1] : vector<16x32xf32> to vector<16xf32>
      %149 = vector.shape_cast %148 : vector<16xf32> to vector<16x1xf32>
      %cst_57 = arith.constant 3.200000e+01 : f32
      %150 = vector.broadcast %cst_57 : f32 to vector<16x1xf32>
      %151 = arith.divf %149, %150 : vector<16x1xf32>
      %152 = vector.broadcast %151 : vector<16x1xf32> to vector<16x32xf32>
      %153 = arith.subf %143, %152 : vector<16x32xf32>
      %154 = arith.mulf %153, %153 : vector<16x32xf32>
      %cst_58 = arith.constant dense<0.000000e+00> : vector<16xf32>
      %155 = vector.multi_reduction <add>, %154, %cst_58 [1] : vector<16x32xf32> to vector<16xf32>
      %156 = vector.shape_cast %155 : vector<16xf32> to vector<16x1xf32>
      %cst_59 = arith.constant 3.200000e+01 : f32
      %157 = vector.broadcast %cst_59 : f32 to vector<16x1xf32>
      %158 = arith.divf %156, %157 : vector<16x1xf32>
      %cst_60 = arith.constant 9.99999974E-6 : f32
      %159 = vector.broadcast %cst_60 : f32 to vector<16x1xf32>
      %160 = arith.addf %158, %159 : vector<16x1xf32>
      %161 = math.rsqrt %160 : vector<16x1xf32>
      %162 = vector.broadcast %161 : vector<16x1xf32> to vector<16x32xf32>
      %163 = arith.mulf %153, %162 : vector<16x32xf32>
      %164 = vector.broadcast %145 : vector<1x32xf32> to vector<16x32xf32>
      %165 = arith.mulf %163, %164 : vector<16x32xf32>
      %166 = vector.broadcast %147 : vector<1x32xf32> to vector<16x32xf32>
      %167 = arith.addf %165, %166 : vector<16x32xf32>
      %c0_61 = arith.constant 0 : index
      %c0_62 = arith.constant 0 : index
      %c0_63 = arith.constant 0 : index
      %168 = vector.load %arg7[%c0_61, %c0_62, %c0_63] : memref<1x32x64xbf16, #tpu.memory_space<vmem>>, vector<1x32x64xbf16>
      %169 = vector.shape_cast %168 : vector<1x32x64xbf16> to vector<32x64xbf16>
      %c0_64 = arith.constant 0 : index
      %c0_65 = arith.constant 0 : index
      %c0_66 = arith.constant 0 : index
      %170 = vector.load %arg8[%c0_64, %c0_65, %c0_66] : memref<1x1x64xf32, #tpu.memory_space<vmem>>, vector<1x1x64xf32>
      %171 = vector.shape_cast %170 : vector<1x1x64xf32> to vector<1x64xf32>
      %172 = arith.truncf %167 : vector<16x32xf32> to vector<16x32xbf16>
      %cst_67 = arith.constant dense<0.000000e+00> : vector<16x64xf32>
      %173 = tpu.matmul %172, %169, %cst_67 {dimension_numbers = #tpu.dot_dimension_numbers<[1], [0], [0], [1], [0, 0, 1, 1], [], []>} : vector<16x32xbf16>, vector<32x64xbf16>, vector<16x64xf32> -> vector<16x64xf32>
      %174 = vector.broadcast %171 : vector<1x64xf32> to vector<16x64xf32>
      %175 = arith.addf %173, %174 : vector<16x64xf32>
      %cst_68 = arith.constant 0.000000e+00 : f32
      %176 = vector.broadcast %cst_68 : f32 to vector<16x64xf32>
      %177 = arith.maximumf %175, %176 : vector<16x64xf32>
      %c0_69 = arith.constant 0 : index
      %c0_70 = arith.constant 0 : index
      %c0_71 = arith.constant 0 : index
      %178 = vector.load %arg9[%c0_69, %c0_70, %c0_71] : memref<1x64x32xbf16, #tpu.memory_space<vmem>>, vector<1x64x32xbf16>
      %179 = vector.shape_cast %178 : vector<1x64x32xbf16> to vector<64x32xbf16>
      %c0_72 = arith.constant 0 : index
      %c0_73 = arith.constant 0 : index
      %c0_74 = arith.constant 0 : index
      %180 = vector.load %arg10[%c0_72, %c0_73, %c0_74] : memref<1x1x32xf32, #tpu.memory_space<vmem>>, vector<1x1x32xf32>
      %181 = vector.shape_cast %180 : vector<1x1x32xf32> to vector<1x32xf32>
      %182 = arith.truncf %177 : vector<16x64xf32> to vector<16x64xbf16>
      %cst_75 = arith.constant dense<0.000000e+00> : vector<16x32xf32>
      %183 = tpu.matmul %182, %179, %cst_75 {dimension_numbers = #tpu.dot_dimension_numbers<[1], [0], [0], [1], [0, 0, 1, 1], [], []>} : vector<16x64xbf16>, vector<64x32xbf16>, vector<16x32xf32> -> vector<16x32xf32>
      %184 = vector.broadcast %181 : vector<1x32xf32> to vector<16x32xf32>
      %185 = arith.addf %183, %184 : vector<16x32xf32>
      %186 = arith.addf %167, %185 : vector<16x32xf32>
      %c0_76 = arith.constant 0 : index
      %c0_77 = arith.constant 0 : index
      %c0_78 = arith.constant 0 : index
      %187 = vector.load %arg13[%c0_76, %c0_77, %c0_78] : memref<1x1x32xf32, #tpu.memory_space<vmem>>, vector<1x1x32xf32>
      %188 = vector.shape_cast %187 : vector<1x1x32xf32> to vector<1x32xf32>
      %c0_79 = arith.constant 0 : index
      %c0_80 = arith.constant 0 : index
      %c0_81 = arith.constant 0 : index
      %189 = vector.load %arg14[%c0_79, %c0_80, %c0_81] : memref<1x1x32xf32, #tpu.memory_space<vmem>>, vector<1x1x32xf32>
      %190 = vector.shape_cast %189 : vector<1x1x32xf32> to vector<1x32xf32>
      %cst_82 = arith.constant dense<0.000000e+00> : vector<16xf32>
      %191 = vector.multi_reduction <add>, %186, %cst_82 [1] : vector<16x32xf32> to vector<16xf32>
      %192 = vector.shape_cast %191 : vector<16xf32> to vector<16x1xf32>
      %cst_83 = arith.constant 3.200000e+01 : f32
      %193 = vector.broadcast %cst_83 : f32 to vector<16x1xf32>
      %194 = arith.divf %192, %193 : vector<16x1xf32>
      %195 = vector.broadcast %194 : vector<16x1xf32> to vector<16x32xf32>
      %196 = arith.subf %186, %195 : vector<16x32xf32>
      %197 = arith.mulf %196, %196 : vector<16x32xf32>
      %cst_84 = arith.constant dense<0.000000e+00> : vector<16xf32>
      %198 = vector.multi_reduction <add>, %197, %cst_84 [1] : vector<16x32xf32> to vector<16xf32>
      %199 = vector.shape_cast %198 : vector<16xf32> to vector<16x1xf32>
      %cst_85 = arith.constant 3.200000e+01 : f32
      %200 = vector.broadcast %cst_85 : f32 to vector<16x1xf32>
      %201 = arith.divf %199, %200 : vector<16x1xf32>
      %cst_86 = arith.constant 9.99999974E-6 : f32
      %202 = vector.broadcast %cst_86 : f32 to vector<16x1xf32>
      %203 = arith.addf %201, %202 : vector<16x1xf32>
      %204 = math.rsqrt %203 : vector<16x1xf32>
      %205 = vector.broadcast %204 : vector<16x1xf32> to vector<16x32xf32>
      %206 = arith.mulf %196, %205 : vector<16x32xf32>
      %207 = vector.broadcast %188 : vector<1x32xf32> to vector<16x32xf32>
      %208 = arith.mulf %206, %207 : vector<16x32xf32>
      %209 = vector.broadcast %190 : vector<1x32xf32> to vector<16x32xf32>
      %210 = arith.addf %208, %209 : vector<16x32xf32>
      %c0_87 = arith.constant 0 : index
      %c0_88 = arith.constant 0 : index
      %211 = vector.load %arg15[%c0_87, %c0_88] : memref<1x32xf32, #tpu.memory_space<vmem>>, vector<1x32xf32>
      %c0_89 = arith.constant 0 : index
      %c0_90 = arith.constant 0 : index
      %212 = vector.load %arg16[%c0_89, %c0_90] : memref<1x32xf32, #tpu.memory_space<vmem>>, vector<1x32xf32>
      %cst_91 = arith.constant dense<0.000000e+00> : vector<16xf32>
      %213 = vector.multi_reduction <add>, %210, %cst_91 [1] : vector<16x32xf32> to vector<16xf32>
      %214 = vector.shape_cast %213 : vector<16xf32> to vector<16x1xf32>
      %cst_92 = arith.constant 3.200000e+01 : f32
      %215 = vector.broadcast %cst_92 : f32 to vector<16x1xf32>
      %216 = arith.divf %214, %215 : vector<16x1xf32>
      %217 = vector.broadcast %216 : vector<16x1xf32> to vector<16x32xf32>
      %218 = arith.subf %210, %217 : vector<16x32xf32>
      %219 = arith.mulf %218, %218 : vector<16x32xf32>
      %cst_93 = arith.constant dense<0.000000e+00> : vector<16xf32>
      %220 = vector.multi_reduction <add>, %219, %cst_93 [1] : vector<16x32xf32> to vector<16xf32>
      %221 = vector.shape_cast %220 : vector<16xf32> to vector<16x1xf32>
      %cst_94 = arith.constant 3.200000e+01 : f32
      %222 = vector.broadcast %cst_94 : f32 to vector<16x1xf32>
      %223 = arith.divf %221, %222 : vector<16x1xf32>
      %cst_95 = arith.constant 9.99999974E-6 : f32
      %224 = vector.broadcast %cst_95 : f32 to vector<16x1xf32>
      %225 = arith.addf %223, %224 : vector<16x1xf32>
      %226 = math.rsqrt %225 : vector<16x1xf32>
      %227 = vector.broadcast %226 : vector<16x1xf32> to vector<16x32xf32>
      %228 = arith.mulf %218, %227 : vector<16x32xf32>
      %229 = vector.broadcast %211 : vector<1x32xf32> to vector<16x32xf32>
      %230 = arith.mulf %228, %229 : vector<16x32xf32>
      %231 = vector.broadcast %212 : vector<1x32xf32> to vector<16x32xf32>
      %232 = arith.addf %230, %231 : vector<16x32xf32>
      %c1_i32 = arith.constant 1 : i32
      %233 = arith.cmpi eq, %arg0, %c1_i32 : i32
      %234 = arith.select %233, %232, %210 : vector<16x32xf32>
      %c0_96 = arith.constant 0 : index
      %c0_97 = arith.constant 0 : index
      %235 = vector.load %arg20[%c0_96, %c0_97] : memref<16x32xf32, #tpu.memory_space<vmem>>, vector<16x32xf32>
      tpu.vector_store %arg20[%c0_96, %c0_97], %234 {strides = array<i32>} : memref<16x32xf32, #tpu.memory_space<vmem>>, vector<16x32xf32>,
    } else {
    }
    %c2_i32_2 = arith.constant 2 : i32
    %6 = arith.cmpi sge, %arg0, %c2_i32_2 : i32
    %7 = arith.extui %6 : i1 to i32
    %c0_i32_3 = arith.constant 0 : i32
    %8 = arith.cmpi ne, %7, %c0_i32_3 : i32
    scf.if %8 {
      %c0 = arith.constant 0 : index
      %c0_4 = arith.constant 0 : index
      %9 = vector.load %arg20[%c0, %c0_4] : memref<16x32xf32, #tpu.memory_space<vmem>>, vector<16x32xf32>
      %c0_5 = arith.constant 0 : index
      %c0_6 = arith.constant 0 : index
      %10 = vector.load %arg17[%c0_5, %c0_6] : memref<32x128xbf16, #tpu.memory_space<vmem>>, vector<32x128xbf16>
      %c0_7 = arith.constant 0 : index
      %c0_8 = arith.constant 0 : index
      %11 = vector.load %arg18[%c0_7, %c0_8] : memref<1x128xf32, #tpu.memory_space<vmem>>, vector<1x128xf32>
      %12 = arith.truncf %9 : vector<16x32xf32> to vector<16x32xbf16>
      %cst = arith.constant dense<0.000000e+00> : vector<16x128xf32>
      %13 = tpu.matmul %12, %10, %cst {dimension_numbers = #tpu.dot_dimension_numbers<[1], [0], [0], [1], [0, 0, 1, 1], [], []>} : vector<16x32xbf16>, vector<32x128xbf16>, vector<16x128xf32> -> vector<16x128xf32>
      %14 = vector.broadcast %11 : vector<1x128xf32> to vector<16x128xf32>
      %15 = arith.addf %13, %14 : vector<16x128xf32>
      %c0_9 = arith.constant 0 : index
      %c0_10 = arith.constant 0 : index
      %16 = vector.load %arg19[%c0_9, %c0_10] : memref<16x128xf32, #tpu.memory_space<vmem>>, vector<16x128xf32>
      tpu.vector_store %arg19[%c0_9, %c0_10], %15 {strides = array<i32>} : memref<16x128xf32, #tpu.memory_space<vmem>>, vector<16x128xf32>,
    } else {
    }
    return
  }
  func.func @transform_0(%arg0: i32) -> (i32, i32) {
    %c0_i32 = arith.constant 0 : i32
    %c0_i32_0 = arith.constant 0 : i32
    %c0_i32_1 = arith.constant 0 : i32
    return %c0_i32, %c0_i32_0 : i32, i32
  }
  func.func @transform_1(%arg0: i32) -> (i32, i32, i32) {
    %c0_i32 = arith.constant 0 : i32
    %c0_i32_0 = arith.constant 0 : i32
    %c0_i32_1 = arith.constant 0 : i32
    %c0_i32_2 = arith.constant 0 : i32
    return %c0_i32, %c0_i32_0, %c0_i32_1 : i32, i32, i32
  }
  func.func @transform_2(%arg0: i32) -> (i32, i32, i32) {
    %c1_i32 = arith.constant 1 : i32
    %0 = arith.minsi %arg0, %c1_i32 : i32
    %c0_i32 = arith.constant 0 : i32
    %c0_i32_0 = arith.constant 0 : i32
    %c0_i32_1 = arith.constant 0 : i32
    return %0, %c0_i32, %c0_i32_0 : i32, i32, i32
  }
  func.func @transform_3(%arg0: i32) -> (i32, i32, i32) {
    %c1_i32 = arith.constant 1 : i32
    %0 = arith.minsi %arg0, %c1_i32 : i32
    %c0_i32 = arith.constant 0 : i32
    %c0_i32_0 = arith.constant 0 : i32
    %c0_i32_1 = arith.constant 0 : i32
    return %0, %c0_i32, %c0_i32_0 : i32, i32, i32
  }
  func.func @transform_4(%arg0: i32) -> (i32, i32, i32) {
    %c1_i32 = arith.constant 1 : i32
    %0 = arith.minsi %arg0, %c1_i32 : i32
    %c0_i32 = arith.constant 0 : i32
    %c0_i32_0 = arith.constant 0 : i32
    %c0_i32_1 = arith.constant 0 : i32
    return %0, %c0_i32, %c0_i32_0 : i32, i32, i32
  }
  func.func @transform_5(%arg0: i32) -> (i32, i32, i32) {
    %c1_i32 = arith.constant 1 : i32
    %0 = arith.minsi %arg0, %c1_i32 : i32
    %c0_i32 = arith.constant 0 : i32
    %c0_i32_0 = arith.constant 0 : i32
    %c0_i32_1 = arith.constant 0 : i32
    return %0, %c0_i32, %c0_i32_0 : i32, i32, i32
  }
  func.func @transform_6(%arg0: i32) -> (i32, i32, i32) {
    %c1_i32 = arith.constant 1 : i32
    %0 = arith.minsi %arg0, %c1_i32 : i32
    %c0_i32 = arith.constant 0 : i32
    %c0_i32_0 = arith.constant 0 : i32
    %c0_i32_1 = arith.constant 0 : i32
    return %0, %c0_i32, %c0_i32_0 : i32, i32, i32
  }
  func.func @transform_7(%arg0: i32) -> (i32, i32, i32) {
    %c1_i32 = arith.constant 1 : i32
    %0 = arith.minsi %arg0, %c1_i32 : i32
    %c0_i32 = arith.constant 0 : i32
    %c0_i32_0 = arith.constant 0 : i32
    %c0_i32_1 = arith.constant 0 : i32
    return %0, %c0_i32, %c0_i32_0 : i32, i32, i32
  }
  func.func @transform_8(%arg0: i32) -> (i32, i32, i32) {
    %c1_i32 = arith.constant 1 : i32
    %0 = arith.minsi %arg0, %c1_i32 : i32
    %c0_i32 = arith.constant 0 : i32
    %c0_i32_0 = arith.constant 0 : i32
    %c0_i32_1 = arith.constant 0 : i32
    return %0, %c0_i32, %c0_i32_0 : i32, i32, i32
  }
  func.func @transform_9(%arg0: i32) -> (i32, i32, i32) {
    %c1_i32 = arith.constant 1 : i32
    %0 = arith.minsi %arg0, %c1_i32 : i32
    %c0_i32 = arith.constant 0 : i32
    %c0_i32_0 = arith.constant 0 : i32
    %c0_i32_1 = arith.constant 0 : i32
    return %0, %c0_i32, %c0_i32_0 : i32, i32, i32
  }
  func.func @transform_10(%arg0: i32) -> (i32, i32, i32) {
    %c1_i32 = arith.constant 1 : i32
    %0 = arith.minsi %arg0, %c1_i32 : i32
    %c0_i32 = arith.constant 0 : i32
    %c0_i32_0 = arith.constant 0 : i32
    %c0_i32_1 = arith.constant 0 : i32
    return %0, %c0_i32, %c0_i32_0 : i32, i32, i32
  }
  func.func @transform_11(%arg0: i32) -> (i32, i32, i32) {
    %c1_i32 = arith.constant 1 : i32
    %0 = arith.minsi %arg0, %c1_i32 : i32
    %c0_i32 = arith.constant 0 : i32
    %c0_i32_0 = arith.constant 0 : i32
    %c0_i32_1 = arith.constant 0 : i32
    return %0, %c0_i32, %c0_i32_0 : i32, i32, i32
  }
  func.func @transform_12(%arg0: i32) -> (i32, i32, i32) {
    %c1_i32 = arith.constant 1 : i32
    %0 = arith.minsi %arg0, %c1_i32 : i32
    %c0_i32 = arith.constant 0 : i32
    %c0_i32_0 = arith.constant 0 : i32
    %c0_i32_1 = arith.constant 0 : i32
    return %0, %c0_i32, %c0_i32_0 : i32, i32, i32
  }
  func.func @transform_13(%arg0: i32) -> (i32, i32, i32) {
    %c1_i32 = arith.constant 1 : i32
    %0 = arith.minsi %arg0, %c1_i32 : i32
    %c0_i32 = arith.constant 0 : i32
    %c0_i32_0 = arith.constant 0 : i32
    %c0_i32_1 = arith.constant 0 : i32
    return %0, %c0_i32, %c0_i32_0 : i32, i32, i32
  }
  func.func @transform_14(%arg0: i32) -> (i32, i32) {
    %c0_i32 = arith.constant 0 : i32
    %c0_i32_0 = arith.constant 0 : i32
    %c0_i32_1 = arith.constant 0 : i32
    return %c0_i32, %c0_i32_0 : i32, i32
  }
  func.func @transform_15(%arg0: i32) -> (i32, i32) {
    %c0_i32 = arith.constant 0 : i32
    %c0_i32_0 = arith.constant 0 : i32
    %c0_i32_1 = arith.constant 0 : i32
    return %c0_i32, %c0_i32_0 : i32, i32
  }
  func.func @transform_16(%arg0: i32) -> (i32, i32) {
    %c2_i32 = arith.constant 2 : i32
    %0 = arith.subi %arg0, %c2_i32 : i32
    %c0_i32 = arith.constant 0 : i32
    %1 = arith.maxsi %0, %c0_i32 : i32
    %c0_i32_0 = arith.constant 0 : i32
    %c0_i32_1 = arith.constant 0 : i32
    return %c0_i32_0, %1 : i32, i32
  }
  func.func @transform_17(%arg0: i32) -> (i32, i32) {
    %c2_i32 = arith.constant 2 : i32
    %0 = arith.subi %arg0, %c2_i32 : i32
    %c0_i32 = arith.constant 0 : i32
    %1 = arith.maxsi %0, %c0_i32 : i32
    %c0_i32_0 = arith.constant 0 : i32
    %c0_i32_1 = arith.constant 0 : i32
    return %c0_i32_0, %1 : i32, i32
  }
  func.func @transform_18(%arg0: i32) -> (i32, i32) {
    %c2_i32 = arith.constant 2 : i32
    %0 = arith.subi %arg0, %c2_i32 : i32
    %c0_i32 = arith.constant 0 : i32
    %1 = arith.maxsi %0, %c0_i32 : i32
    %c0_i32_0 = arith.constant 0 : i32
    %c0_i32_1 = arith.constant 0 : i32
    return %c0_i32_0, %1 : i32, i32
  }
}

</mosaic_0001>

<bundles_post_ra>
// kernel: tpu_custom_call.1
= control target key start
LH: loop header
LB: loop body
LE: loop exit
PB: predicated region body
PF: predicated region fallthrough
CT: control target
= control target key end

     0   :  { %s4327_s0 = inlined_call_operand.hbm [shape: f32[16,32], index: 0, kind: input, shape index: {}]   ;;  %s4328_s1 = inlined_call_operand.vmem [shape: f32[2,1,8], index: 1, kind: input, shape index: {}]   ;;  %s4329_s2 = inlined_call_operand.vmem [shape: bf16[2,32,96], index: 2, kind: input, shape index: {}]   ;;  %s4330_s3 = inlined_call_operand.hbm [shape: f32[2,1,96], index: 3, kind: input, shape index: {}]   ;;  %s4331_s4 = inlined_call_operand.vmem [shape: bf16[2,32,32], index: 4, kind: input, shape index: {}]   ;;  %s4332_s5 = inlined_call_operand.hbm [shape: f32[2,1,32], index: 5, kind: input, shape index: {}]   ;;  %s4333_s6 = inlined_call_operand.vmem [shape: bf16[2,32,64], index: 6, kind: input, shape index: {}]   ;;  %s4334_s7 = inlined_call_operand.hbm [shape: f32[2,1,64], index: 7, kind: input, shape index: {}]   ;;  %s4335_s8 = inlined_call_operand.vmem [shape: bf16[2,64,32], index: 8, kind: input, shape index: {}]   ;;  %s4336_s9 = inlined_call_operand.hbm [shape: f32[2,1,32], index: 9, kind: input, shape index: {}]   ;;  %s4337_s10 = inlined_call_operand.vmem [shape: f32[2,1,32], index: 10, kind: input, shape index: {}]   ;;  %s4338_s11 = inlined_call_operand.vmem [shape: f32[2,1,32], index: 11, kind: input, shape index: {}]   ;;  %s4339_s12 = inlined_call_operand.vmem [shape: f32[2,1,32], index: 12, kind: input, shape index: {}]   ;;  %s4340_s13 = inlined_call_operand.vmem [shape: f32[2,1,32], index: 13, kind: input, shape index: {}]   ;;  %s4341_s14 = inlined_call_operand.vmem [shape: f32[1,32], index: 14, kind: input, shape index: {}]   ;;  %s4342_s15 = inlined_call_operand.vmem [shape: f32[1,32], index: 15, kind: input, shape index: {}]   ;;  %s4343_s16 = inlined_call_operand.vmem [shape: bf16[32,256], index: 16, kind: input, shape index: {}]   ;;  %s4344_s17 = inlined_call_operand.vmem [shape: f32[1,256], index: 17, kind: input, shape index: {}]   ;;  %s4345_s18 = inlined_call_operand.hbm [shape: f32[16,256], index: 18, kind: output, shape index: {}]  }
   0x1   :  { %4366 = sst [smem:[#allocation28_spill]] %s4327_s0 }
   0x2   :  { %4367 = sst [smem:[#allocation29_spill]] %s4328_s1 }
   0x3   :  { %4368 = sst [smem:[#allocation30_spill]] %s4329_s2 }
   0x4   :  { %4369 = sst [smem:[#allocation31_spill]] %s4330_s3 }
   0x5   :  { %4370 = sst [smem:[#allocation32_spill]] %s4331_s4 }
   0x6   :  { %4371 = sst [smem:[#allocation33_spill]] %s4332_s5 }
   0x7   :  { %4372 = sst [smem:[#allocation34_spill]] %s4333_s6 }
   0x8   :  { %4373 = sst [smem:[#allocation35_spill]] %s4334_s7 }
   0x9   :  { %4374 = sst [smem:[#allocation36_spill]] %s4335_s8 }
   0xa   :  { %4375 = sst [smem:[#allocation37_spill]] %s4336_s9 }
   0xb   :  { %4376 = sst [smem:[#allocation38_spill]] %s4337_s10 }
   0xc   :  { %4377 = sst [smem:[#allocation39_spill]] %s4338_s11 }
   0xd   :  { %4378 = sst [smem:[#allocation40_spill]] %s4339_s12 }
   0xe   :  { %4379 = sst [smem:[#allocation41_spill]] %s4340_s13 }
   0xf   :  { %4380 = sst [smem:[#allocation42_spill]] %s4341_s14 }
  0x10   :  { %4381 = sst [smem:[#allocation43_spill]] %s4342_s15 }
  0x11   :  { %4382 = sst [smem:[#allocation44_spill]] %s4343_s16 }
  0x12   :  { %4383 = sst [smem:[#allocation45_spill]] %s4344_s17 }
  0x13   :  { %4384 = sst [smem:[#allocation46_spill]] %s4345_s18 }
  0x14   :  { %23 = vsyncpa [#allocation5], 0 }
  0x15   :  { %24 = vsyncpa [#allocation8], 0 }
  0x16   :  { %26 = vsyncpa [#allocation8 + $0x1], 0 }
  0x17   :  { %27 = vsyncpa [#allocation11], 0 }
  0x18   :  { %29 = vsyncpa [#allocation11 + $0x1], 0 }
  0x19   :  { %30 = vsyncpa [#allocation6], 0 }
  0x1a   :  { %32 = vsyncpa [#allocation6 + $0x1], 0  ;;  %s3677_s27 = smov 0   ;;  %s3679_s28 = smov 0  }
  0x1b   :  { %s3681_s29 = smov 0   ;;  %s3683_s30 = smov 0  }
  0x1c   :  { %s3685_s0 = smov 0   ;;  %s3687_s19 = smov 0  }
  0x1d   :  { %s3689_s1 = smov 0  }
  0x1e LB: > { %4385 = sst [smem:[#allocation19_spill]] %s3527_s27  ;;  %s3711_s20 = sadd.s32 4294967295, %s3551_s1   ;;  %s3551_s1 = sphi %s3689_s1, %s4443_s1   ;;  %s3547_s19 = sphi %s3687_s19, %s4448_s19   ;;  %s3543_s0 = sphi %s3685_s0, %s4447_s0   ;;  %s3539_s30 = sphi %s3683_s30, %s4446_s30   ;;  %s3535_s29 = sphi %s3681_s29, %s4445_s29   ;;  %s3531_s28 = sphi %s3679_s28, %s4450_s28   ;;  %s3527_s27 = sphi %s3677_s27, %s4449_s27  }
  0x1f   : > { %4386 = sst [smem:[#allocation20_spill]] %s3535_s29  ;;  %s3714_s21 = sadd.s32 4294967294, %s3551_s1  }
  0x20   : > { %4387 = sst [smem:[#allocation21_spill]] %s3543_s0  ;;  %s3717_s22 = sadd.s32 1, %s3551_s1  }
  0x21   : > { %4388 = sst [smem:[#allocation22_spill]] %s3547_s19  ;;  %p114_p0 = scmp.lt.s32.totalorder %s3551_s1, 1 }
  0x22   : > { %4389 = sst [smem:[#allocation23_spill]] %s3717_s22  ;;  %p116_p1 = scmp.lt.s32.totalorder %s3717_s22, 1 }
  0x23   : > { %s121_s2 = sadd.s32 1, %s3547_s19  ;;  %p128_p2 = scmp.ne.s32.totalorder %s3547_s19, %s3543_s0 }
  0x24   : > { %s3723_s23 = scalar_select %p114_p0, %s3551_s1, 1 }
  0x25   : > { %s117_s24 = scalar_select %p116_p1, %s3717_s22, 1 }
  0x26   : > { %p129_p3 = scmp.eq.s32.totalorder %s3551_s1, 0  ;;  %p134_p4 = scmp.ne.s32.totalorder %s3543_s0, %s3539_s30 }
  0x27   : > { %s118_s25 = ssub.s32 %s3723_s23, %s117_s24  ;;  %p4351_p7 = scmp.eq.s32.totalorder %s3711_s20, 0 }
  0x28   : > { %p119_p5 = scmp.eq.s32.totalorder %s118_s25, 0  ;;  %p3733_p6 = por %p129_p3, %p128_p2 }
  0x29   : > { %p487_p8 = scmp.gt.s32.totalorder %s3714_s21, 0  ;;  %p3744_p9 = por %p4351_p7, %p134_p4 }
  0x2a   : > { %s4390_s26 = scalar_select %p3733_p6, 1, 0 }
  0x2b   : > { %s3740_s18 = scalar_select %p119_p5, %s3547_s19, %s121_s2  }
  0x2c   : > { %s4392_s15 = scalar_select %p3744_p9, 1, 0 }
  0x2d   : > { %4391 = sst [smem:[#allocation24_spill]] %s3740_s18  ;;  %s2846_s30 = sadd.s32 4294967294, %s3717_s22 }
  0x2e   : > { %s3750_s24 = scalar_select %p487_p8, %s3714_s21, 0 }
  0x2f   : > { %p490_p10 = scmp.gt.s32.totalorder %s2846_s30, 0  ;;  %s495_s25 = sadd.s32 1, %s3535_s29 }
  0x30   : > { %p502_p11 = scmp.ne.s32.totalorder %s3535_s29, %s3531_s28  ;;  %p570_p12 = scmp.eq.s32.totalorder %s3711_s20, 3 }
  0x31   : > { %s4452_s30 = smov (!%p490_p10, %s2846_s30), 0  ;;  %p575_p1 = scmp.ne.s32.totalorder %s3531_s28, %s3527_s27 }
  0x32   : > { %p3758_p13 = por %p502_p11, %p129_p3  ;;  %p3762_p0 = por %p570_p12, %p502_p11 }
  0x33   : > { %s492_s22 = ssub.s32 %s3750_s24, %s4452_s30  ;;  %p576_p4 = scmp.eq.s32.totalorder %s3714_s21, 3 }
  0x34   : > { %s4393_s2 = scalar_select %p3758_p13, 1, 0 }
  0x35   : > { %s4394_s18 = scalar_select %p3762_p0, 1, 0 }
  0x36   : > { %p493_p2 = scmp.eq.s32.totalorder %s492_s22, 0  ;;  %p2851_p5 = scmp.ge.s32.totalorder %s3551_s1, 1 }
  0x37   : > { %4395 = sst [smem:[#allocation25_spill]] %s4394_s18  ;;  %p583_p8 = scmp.lt.s32.totalorder %s3551_s1, 5 }
  0x38   : > { %s3773_s14 = scalar_select %p493_p2, %s3535_s29, %s495_s25  }
  0x39   : > { %p3775_p7 = por %p576_p4, %p575_p1  ;;  %p3779_p3 = pnand %p2851_p5, %p583_p8 }
  0x3a   : > { %4396 = sst [smem:[#allocation26_spill]] %s3773_s14  ;;  %s3553_s30 = smov [#allocation4]  }
  0x3b   : > { %s4397_s17 = scalar_select %p3775_p7, 1, 0 }
  0x3c   : > { %s4399_s13 = scalar_select %p3779_p3, 1, 0 }
  0x3d   : > { %4398 = sst [smem:[#allocation27_spill]] %s4397_s17  ;;  %p3166_p11 = pneg %p3779_p3 }
  0x3e   : > { %s595_s27 = sshll.u32 %s3553_s30, 4  ;;  %p4400_p12 = scmp.eq.s32.totalorder %s3711_s20, 0  ;;  %s596_s27 = int_to_ptr.vmem [resolvable:$true] %s595_s27 }
  0x3f   : > { %s4402_s14 = sld [smem:[#allocation28_spill]] }
  0x40   : > { %p3788_p0 = pnand %p3166_p11, %p4400_p12 }
  0x42   : > { %p3315_p2 = pneg %p3788_p0 }
  0x45   : > { %s3313_s17 = scalar_lea.hbm %s4402_s14, 256 }
  0x46   : > { %p3314_p1 = scmp.ne.s32.totalorder %s4402_s14, %s3313_s17  ;;  %p3320_p8 = scmp.lt.u32.totalorder %s3313_s17, %s4402_s14 }
  0x48   : > { %p3316_p4 = pnand %p3315_p2, %p3314_p1 }
  0x4a   : > { %p3317_p5 = pneg %p3316_p4 }
  0x4c   : > { %p3322_p11 = pnand %p3320_p8, %p3317_p5 }
  0x4e   : > { %3325 = shalt.err (!%p3322_p11)
}
  0x4f   : > { %s3326_s10 = scalar_lea.vmem %s596_s27, 256  ;;  %p3334_p9 = scmp.lt.s32.totalorder %s596_s27, %s596_s27 }
  0x50   : > { %p3327_p12 = scmp.ne.s32.totalorder %s596_s27, %s3326_s10  ;;  %p3335_p3 = scmp.lt.s32.totalorder %s3326_s10, %s3326_s10 }
  0x52   : > { %p3329_p10 = pnand %p3327_p12, %p3315_p2  ;;  %p3336_p13 = por %p3335_p3, %p3334_p9 }
  0x54   : > { %p3330_p7 = pneg %p3329_p10 }
  0x56   : > { %p3337_p6 = pnand %p3336_p13, %p3330_p7 }
  0x58   : > { %3340 = shalt.err (!%p3337_p6)
}
  0x59   : > { %s3554_s12 = smov 128   ;;  %s3555_s18 = smov 8  }
  0x5a   : > { %3169 = dma.hbm_to_vmem [thread:$0]  (!%p3788_p0), %s4402_s14, 256, %s596_s27, [#allocation5], %s3554_s12, %s3554_s12, %s3555_s18  }
  0x5b   : > { %p2853_p1 = scmp.ge.s32.totalorder %s3551_s1, 4 }
  0x5c   : > { %s4360_s10 = sand.u32 (!%p2853_p1), 1, %s3551_s1   ;;  %s3811_s11 = sand.u32 (!%p2853_p1), 1, %s3547_s19  }
  0x5d   : > { %614 = sbr.rel (%p2853_p1) target bundleno = 219 (0xdb), region = 32  ;;  %s3814_s17 = sshll.u32 (!%p2853_p1), %s3723_s23, 4 }
  0x5e   : > { %s633_s21 = scalar_lea.vmem (!%p2853_p1), [#allocation7], %s3811_s11  ;;  %s4403_s3 = sld [smem:[#allocation31_spill]] (!%p2853_p1) }
  0x5f   : > { %s642_s30 = sshll.u32 (!%p2853_p1), %s633_s21, 4  ;;  %s3825_s12 = scalar_lea.sflag (!%p2853_p1), [#allocation8], %s4360_s10  ;;  %s643_s30 = int_to_ptr.vmem [resolvable:$true] %s642_s30 }
  0x60   : > { %p4404_p7 = scmp.ne.s32.totalorder (!%p2853_p1), %s4390_s26, 0 }
  0x64   : > { %s3821_s27 = scalar_lea.hbm %s4403_s3, %s3814_s17  ;;  %s3345_s21 = scalar_lea.hbm %s4403_s3, 32 }
  0x65   : > { %s3341_s18 = scalar_lea.hbm %s3821_s27, 16  ;;  %p3346_p0 = scmp.lt.u32.totalorder %s3821_s27, %s4403_s3 }
  0x66   : > { %p3342_p6 = scmp.ne.s32.totalorder %s3821_s27, %s3341_s18  ;;  %p3347_p3 = scmp.lt.u32.totalorder %s3345_s21, %s3341_s18 }
  0x67   : > { %p3349_p2 = scmp.lt.u32.totalorder %s3341_s18, %s3821_s27 }
  0x68   : > { %p3343_p9 = pnand %p3342_p6, %p4404_p7  ;;  %p3348_p10 = por %p3347_p3, %p3346_p0 }
  0x6a   : > { %p3344_p13 = pneg %p3343_p9  ;;  %p3350_p4 = por %p3349_p2, %p3348_p10 }
  0x6c   : > { %p3351_p5 = pnand %p3350_p4, %p3344_p13 }
  0x6e   : > { %3354 = shalt.err (!%p3351_p5)
}
  0x6f   : > { %s3355_s10 = scalar_lea.vmem %s643_s30, 16  ;;  %s3556_s14 = smov [#allocation7]  }
  0x70   : > { %p3356_p8 = scmp.ne.s32.totalorder %s643_s30, %s3355_s10  ;;  %s3359_s19 = sshll.u32 %s3556_s14, 4  ;;  %s3360_s19 = int_to_ptr.vmem [resolvable:$false] %s3359_s19 }
  0x71   : > { %s3361_s23 = scalar_lea.vmem %s3360_s19, 32  ;;  %p3362_p1 = scmp.lt.s32.totalorder %s643_s30, %s3360_s19 }
  0x72   : > { %p3357_p11 = pnand %p3356_p8, %p4404_p7  ;;  %p3363_p6 = scmp.lt.s32.totalorder %s3361_s23, %s3355_s10 }
  0x74   : > { %p3358_p12 = pneg %p3357_p11  ;;  %p3364_p9 = por %p3363_p6, %p3362_p1 }
  0x76   : > { %p3365_p0 = pnand %p3364_p9, %p3358_p12 }
  0x78   : > { %3368 = shalt.err (!%p3365_p0)
}
  0x79   : > { %3154 = dma.hbm_to_vmem [thread:$0]  (%p4404_p7), %s3821_s27, 16, %s643_s30, %s3825_s12  }
  0x7a   : > { %s4405_s7 = sld [smem:[#allocation35_spill]]  ;;  %s695_s19 = scalar_lea.vmem [#allocation10], %s3811_s11 }
  0x7b   : > { %s704_s10 = sshll.u32 %s695_s19, 4  ;;  %s4406_s21 = sand.u32 1, %s3551_s1   ;;  %s705_s10 = int_to_ptr.vmem [resolvable:$true] %s704_s10 }
  0x7c   : > { %s3854_s8 = scalar_lea.sflag [#allocation11], %s4406_s21 }
  0x80   : > { %s3849_s14 = scalar_lea.hbm %s4405_s7, %s3814_s17  ;;  %s3373_s23 = scalar_lea.hbm %s4405_s7, 32 }
  0x81   : > { %s3369_s22 = scalar_lea.hbm %s3849_s14, 16  ;;  %p3374_p2 = scmp.lt.u32.totalorder %s3849_s14, %s4405_s7 }
  0x82   : > { %p3370_p13 = scmp.ne.s32.totalorder %s3849_s14, %s3369_s22  ;;  %p3375_p4 = scmp.lt.u32.totalorder %s3373_s23, %s3369_s22 }
  0x83   : > { %p3377_p8 = scmp.lt.u32.totalorder %s3369_s22, %s3849_s14 }
  0x84   : > { %p3371_p3 = pnand %p3370_p13, %p4404_p7  ;;  %p3376_p5 = por %p3375_p4, %p3374_p2 }
  0x86   : > { %p3372_p10 = pneg %p3371_p3  ;;  %p3378_p11 = por %p3377_p8, %p3376_p5 }
  0x88   : > { %p3379_p12 = pnand %p3378_p11, %p3372_p10 }
  0x8a   : > { %3382 = shalt.err (!%p3379_p12)
}
  0x8b   : > { %s3383_s19 = scalar_lea.vmem %s705_s10, 16  ;;  %s3557_s21 = smov [#allocation10]  }
  0x8c   : > { %p3384_p1 = scmp.ne.s32.totalorder %s705_s10, %s3383_s19  ;;  %s3387_s3 = sshll.u32 %s3557_s21, 4  ;;  %s3388_s3 = int_to_ptr.vmem [resolvable:$false] %s3387_s3 }
  0x8d   : > { %s3389_s30 = scalar_lea.vmem %s3388_s3, 32  ;;  %p3390_p0 = scmp.lt.s32.totalorder %s705_s10, %s3388_s3 }
  0x8e   : > { %p3385_p6 = pnand %p3384_p1, %p4404_p7  ;;  %p3391_p13 = scmp.lt.s32.totalorder %s3389_s30, %s3383_s19 }
  0x90   : > { %p3386_p9 = pneg %p3385_p6  ;;  %p3392_p3 = por %p3391_p13, %p3390_p0 }
  0x92   : > { %p3393_p2 = pnand %p3392_p3, %p3386_p9 }
  0x94   : > { %3396 = shalt.err (!%p3393_p2)
}
  0x95   : > { %3156 = dma.hbm_to_vmem [thread:$0]  (%p4404_p7), %s3849_s14, 16, %s705_s10, %s3854_s8  }
  0x96   : > { %s4407_s5 = sld [smem:[#allocation33_spill]]  ;;  %s664_s3 = scalar_lea.vmem [#allocation9], %s3811_s11 }
  0x97   : > { %s673_s18 = sshll.u32 %s664_s3, 4  ;;  %s674_s18 = int_to_ptr.vmem [resolvable:$true] %s673_s18 }
  0x9c   : > { %s3878_s23 = scalar_lea.hbm %s4407_s5, %s3814_s17  ;;  %s3401_s14 = scalar_lea.hbm %s4407_s5, 32 }
  0x9d   : > { %s3397_s25 = scalar_lea.hbm %s3878_s23, 16  ;;  %p3402_p8 = scmp.lt.u32.totalorder %s3878_s23, %s4407_s5 }
  0x9e   : > { %p3398_p10 = scmp.ne.s32.totalorder %s3878_s23, %s3397_s25  ;;  %p3403_p11 = scmp.lt.u32.totalorder %s3401_s14, %s3397_s25 }
  0x9f   : > { %p3405_p1 = scmp.lt.u32.totalorder %s3397_s25, %s3878_s23 }
  0xa0   : > { %p3399_p4 = pnand %p3398_p10, %p4404_p7  ;;  %p3404_p12 = por %p3403_p11, %p3402_p8 }
  0xa2   : > { %p3400_p5 = pneg %p3399_p4  ;;  %p3406_p6 = por %p3405_p1, %p3404_p12 }
  0xa4   : > { %p3407_p9 = pnand %p3406_p6, %p3400_p5 }
  0xa6   : > { %3410 = shalt.err (!%p3407_p9)
}
  0xa7   : > { %s3411_s22 = scalar_lea.vmem %s674_s18, 16  ;;  %s3558_s27 = smov [#allocation9]  }
  0xa8   : > { %p3412_p0 = scmp.ne.s32.totalorder %s674_s18, %s3411_s22  ;;  %s3415_s3 = sshll.u32 %s3558_s27, 4  ;;  %s3416_s3 = int_to_ptr.vmem [resolvable:$false] %s3415_s3 }
  0xa9   : > { %s3417_s19 = scalar_lea.vmem %s3416_s3, 32  ;;  %p3418_p2 = scmp.lt.s32.totalorder %s674_s18, %s3416_s3 }
  0xaa   : > { %p3413_p13 = pnand %p3412_p0, %p4404_p7  ;;  %p3419_p10 = scmp.lt.s32.totalorder %s3417_s19, %s3411_s22 }
  0xac   : > { %p3414_p3 = pneg %p3413_p13  ;;  %p3420_p4 = por %p3419_p10, %p3418_p2 }
  0xae   : > { %p3421_p8 = pnand %p3420_p4, %p3414_p3 }
  0xb0   : > { %3424 = shalt.err (!%p3421_p8)
}
  0xb1   : > { %3155 = dma.hbm_to_vmem [thread:$0]  (%p4404_p7), %s3878_s23, 16, %s674_s18, %s3825_s12  }
  0xb2   : > { %s4408_s9 = sld [smem:[#allocation37_spill]]  ;;  %s726_s10 = scalar_lea.vmem [#allocation12], %s3811_s11 }
  0xb3   : > { %s735_s30 = sshll.u32 %s726_s10, 4  ;;  %s736_s30 = int_to_ptr.vmem [resolvable:$true] %s735_s30 }
  0xb8   : > { %s3903_s14 = scalar_lea.hbm %s4408_s9, %s3814_s17  ;;  %s3429_s12 = scalar_lea.hbm %s4408_s9, 32 }
  0xb9   : > { %s3425_s22 = scalar_lea.hbm %s3903_s14, 16  ;;  %p3430_p1 = scmp.lt.u32.totalorder %s3903_s14, %s4408_s9 }
  0xba   : > { %p3426_p5 = scmp.ne.s32.totalorder %s3903_s14, %s3425_s22  ;;  %p3431_p6 = scmp.lt.u32.totalorder %s3429_s12, %s3425_s22 }
  0xbb   : > { %p3433_p0 = scmp.lt.u32.totalorder %s3425_s22, %s3903_s14 }
  0xbc   : > { %p3427_p11 = pnand %p3426_p5, %p4404_p7  ;;  %p3432_p9 = por %p3431_p6, %p3430_p1 }
  0xbe   : > { %p3428_p12 = pneg %p3427_p11  ;;  %p3434_p13 = por %p3433_p0, %p3432_p9 }
  0xc0   : > { %p3435_p3 = pnand %p3434_p13, %p3428_p12 }
  0xc2   : > { %3438 = shalt.err (!%p3435_p3)
}
  0xc3   : > { %s3439_s11 = scalar_lea.vmem %s736_s30, 16  ;;  %s3559_s17 = smov [#allocation12]  }
  0xc4   : > { %p3440_p2 = scmp.ne.s32.totalorder %s736_s30, %s3439_s11  ;;  %s3443_s19 = sshll.u32 %s3559_s17, 4  ;;  %s3444_s19 = int_to_ptr.vmem [resolvable:$false] %s3443_s19 }
  0xc5   : > { %s3445_s25 = scalar_lea.vmem %s3444_s19, 32  ;;  %p3446_p8 = scmp.lt.s32.totalorder %s736_s30, %s3444_s19 }
  0xc6   : > { %p3441_p10 = pnand %p3440_p2, %p4404_p7  ;;  %p3447_p5 = scmp.lt.s32.totalorder %s3445_s25, %s3439_s11 }
  0xc8   : > { %p3442_p4 = pneg %p3441_p10  ;;  %p3448_p11 = por %p3447_p5, %p3446_p8 }
  0xca   : > { %p3449_p1 = pnand %p3448_p11, %p3442_p4 }
  0xcc   : > { %3452 = shalt.err (!%p3449_p1)
}
  0xcd   : > { %3157 = dma.hbm_to_vmem [thread:$0]  (%p4404_p7), %s3903_s14, 16, %s736_s30, %s3854_s8  }
  0xce   : > { %p4409_p12 = scmp.ne.s32.totalorder %s4393_s2, 0 }
  0xcf   : > { %s783_s21 = sand.u32 (%p4409_p12), 1, %s3535_s29   ;;  %s2860_s10 = sshll.u32 (%p4409_p12), %s3750_s24, 2 }
  0xd0   : > { %781 = sbr.rel (!%p4409_p12) target bundleno = 219 (0xdb), region = 84  ;;  %s2858_s22 = sshll.u32 (%p4409_p12), %s783_s21, 4 }
  0xd1   : > { %s4410_s16 = sld [smem:[#allocation44_spill]] (%p4409_p12)  ;;  %s785_s23 = scalar_lea.vmem (%p4409_p12), [#allocation13], %s2858_s22 }
  0xd7   : > { %s790_s12 = scalar_lea.vmem %s4410_s16, %s2860_s10 }
  0xd8   : > { %v806_v0 = vld [vmem:[%s790_s12] sm:$0xf]  ;;  %v808_v1 = vld [vmem:[%s790_s12 + $0x8] sm:$0xf]  ;;  %v810_v2 = vld [vmem:[%s790_s12 + $0x10] sm:$0xf] }
  0xd9   : > { %807 = vst [vmem:[%s785_s23] sm:$0xf] %v806_v0  ;;  %809 = vst [vmem:[%s785_s23 + $0x4] sm:$0xf] %v808_v1  ;;  %v812_v3 = vld [vmem:[%s790_s12 + $0x18] sm:$0xf] }
  0xda   : > { %811 = vst [vmem:[%s785_s23 + $0x8] sm:$0xf] %v810_v2  ;;  %813 = vst [vmem:[%s785_s23 + $0xc] sm:$0xf] %v812_v3 }
  0xdb PF: > { %p4411_p7 = scmp.ne.s32.totalorder %s4399_s13, 0 }
  0xdc   : > { %p4412_p6 = scmp.eq.s32.totalorder (!%p4411_p7), %s3711_s20, 0 }
  0xdd   : > { %859 = sbr.rel (%p4411_p7) target bundleno = 4957 (0x135d), region = 129 }
  0xe4   : > { %3510 = dma.done.wait (%p4412_p6), [#allocation5], 256   ;;  %p4413_p9 = pmov %p4412_p6 }
  0xe5   : > { %s865_s26 = sand.u32 1, %s3711_s20   ;;  %s3939_s24 = sand.u32 1, %s3543_s0  }
  0xe6   : > { %3512 = vsyncadd (%p4413_p9), [#allocation5], 4294967040  ;;  %s866_s2 = scalar_lea.sflag [#allocation8], %s865_s26  ;;  %p4414_p0 = scmp.ne.s32.totalorder %s4392_s15, 0 }
  0xe8   : > { %3514 = dma.done.wait (%p4414_p0), %s866_s2, 32  }
  0xe9   : > { %3516 = vsyncadd (%p4414_p0), %s866_s2, 4294967264  ;;  %s882_s14 = scalar_lea.sflag [#allocation11], %s865_s26 }
  0xea   : > { %3518 = dma.done.wait (%p4414_p0), %s882_s14, 32  }
  0xeb   : > { %3520 = vsyncadd (%p4414_p0), %s882_s14, 4294967264  ;;  %s4363_s18 = sand.u32 1, %s3531_s28   ;;  %p1021_p13 = scmp.lt.s32.totalorder %s3711_s20, 1 }
  0xec   : > { %s3955_s11 = sshll.u32 %s4363_s18, 4  ;;  %s2897_s19 = sadd.s32 4294967294, %s3711_s20 }
  0xed   : > { %s1022_s17 = scalar_select %p1021_p13, %s3711_s20, 1 }
  0xee   : > { %p1097_p3 = scmp.gt.s32.totalorder %s2897_s19, 0  ;;  %p2898_p2 = scmp.lt.s32.totalorder %s2897_s19, 1 }
  0xef   : > { %s4454_s17 = smov (!%p1021_p13, %s1022_s17), 1  ;;  %s4415_s22 = sld [smem:[#allocation30_spill]] }
  0xf0   : > { %s2957_s15 = sshll.u32 %s4454_s17, 4  ;;  %s2960_s25 = sshll.u32 %s4454_s17, 5 }
  0xf1   : > { %s4416_s4 = sld [smem:[#allocation32_spill]]  ;;  %s4417_s6 = sld [smem:[#allocation34_spill]] }
  0xf2   : > { %s4418_s13 = sld [smem:[#allocation36_spill]]  ;;  %s4419_s9 = sld [smem:[#allocation38_spill]] }
  0xf3   : > { %s4420_s16 = sld [smem:[#allocation39_spill]]  ;;  %s4421_s0 = sld [smem:[#allocation40_spill]] }
  0xf4   : > { %s4422_s2 = sld [smem:[#allocation41_spill]]  ;;  %s4456_s19 = smov (!%p1097_p3, %s2897_s19), 0 }
  0xf5   : > { %s1027_s27 = scalar_lea.vmem %s4415_s22, %s2957_s15  ;;  %s892_s18 = scalar_lea.vmem [#allocation12], %s3939_s24 }
  0xf6   : > { %p4424_p10 = scmp.ne.s32.totalorder %s3711_s20, 0 }
  0xf7   : > { %s3970_s23 = scalar_lea.vmem %s4416_s4, %s2957_s15  ;;  %s3975_s14 = scalar_lea.vmem %s4417_s6, %s2957_s15  ;;  %v1113_v4 = vld [vmem:[#allocation4] sm:$0xff] (!%p4424_p10)  ;;  %vm1115_vm0 = vcmask (!%p4424_p10), 261120   ;;  %v1114_v5 = vld [vmem:[#allocation4 + $0x8] sm:$0xff] (!%p4424_p10) }
  0xf8   : > { %s3980_s8 = scalar_lea.vmem %s4418_s13, %s2960_s25  ;;  %s1069_s21 = scalar_lea.vmem %s4419_s9, %s4454_s17  ;;  %1116 = vst.msk [vmem:[#allocation2] sm:$0xff] (!%p4424_p10), %vm1115_vm0, %v1113_v4  ;;  %1117 = vst.msk [vmem:[#allocation2 + $0x8] sm:$0xff] (!%p4424_p10), %vm1115_vm0, %v1114_v5 }
  0xf9   : > { %s1076_s3 = scalar_lea.vmem %s4420_s16, %s4454_s17  ;;  %s1083_s29 = scalar_lea.vmem %s4421_s0, %s4454_s17 }
  0xfa   : > { %s1090_s6 = scalar_lea.vmem %s4422_s2, %s4454_s17  ;;  %s4423_s9 = sld [smem:[#allocation45_spill]] }
  0xfb   : > { %s4001_s13 = scalar_select %p2898_p2, %s4456_s19, 1 }
  0xfc   : > { %s900_s16 = scalar_lea.vmem [#allocation13], %s3955_s11  ;;  %s4010_s25 = scalar_lea.vmem [#allocation14], %s3955_s11 }
  0xfd   : > { %1112 = sbr.rel (%p4424_p10) target bundleno = 260 (0x104), region = 157 }
 0x100   : > { %s1101_s30 = scalar_lea.vmem %s4423_s9, %s4001_s13 }
 0x104 PF: > { %p2904_p4 = scmp.ge.s32.totalorder %s3711_s20, 2 }
 0x105   : > { %v3257_v6 = vld [vmem:[%s1027_s27] sm:$0xff] (!%p2904_p4)   ;;  %v3560_v7 = vmov (!%p2904_p4), 0.0   ;;  %v3258_v8 = vld [vmem:[%s1027_s27 + $0x8] sm:$0xff] (!%p2904_p4)   ;;  %vm3561_vm1 = vmmov (!%p2904_p4), 0   ;;  %vm1170_vm2 = vcmask (!%p2904_p4), 261120   ;;  %s4425_s4 = scalar_lea.vmem (!%p2904_p4), [#allocation7], %s3939_s24  ;;  %v1124_v25 = vlaneseq (!%p2904_p4) }
 0x106   : > { %1121 = sbr.rel (%p2904_p4) target bundleno = 4701 (0x125d), region = 161  ;;  %3012 = vmatprep.subr.bf16.mxu0 (!%p2904_p4), %v3560_v7  ;;  %3020 = vmatprep.subr.bf16.mxu1 (!%p2904_p4), %v3560_v7  ;;  %v4019_v9 = vld [vmem:[#allocation2] sm:$0xff] (!%p2904_p4)  ;;  %v4021_v10 = vld [vmem:[#allocation2 + $0x8] sm:$0xff] (!%p2904_p4)  ;;  %s3562_s0 = smov (!%p2904_p4), 96   ;;  %vm1220_vm3 = vcmask (!%p2904_p4), 64512   ;;  %vm1349_vm5 = vcmask (!%p2904_p4), 1043456  }
 0x107   : > { %3013 = vmatpush3.bf16.msra.mxu0 (!%p2904_p4), %v3257_v6  ;;  %3016 = vmatprep.mubr.msk.bf16.mxu0 (!%p2904_p4), %vm3561_vm1, %v3560_v7  ;;  %v1151_v11 = vpack.c.bf16 (!%p2904_p4), %v4021_v10, %v4019_v9  ;;  %v2907_v12 = vld [vmem:[%s4425_s4] ss:$0 sm:$0xff] (!%p2904_p4)  ;;  %v1125_v26 = vshrl.u32 (!%p2904_p4), %v1124_v25, 7  ;;  %v1127_v27 = vand.u32 (!%p2904_p4), 127, %v1124_v25  ;;  %s4426_s22 = sld [smem:[#allocation29_spill]] (!%p2904_p4)  ;;  %s3563_s15 = smov (!%p2904_p4), 64  }
 0x108   : > { %3014 = vmatprep.subr.bf16.mxu0 (!%p2904_p4), %v3560_v7  ;;  %3022 = vmatprep.mubr.msk.bf16.mxu1 (!%p2904_p4), %vm3561_vm1, %v3560_v7  ;;  %s3564_s2 = smov (!%p2904_p4), 88   ;;  %s3565_s5 = smov (!%p2904_p4), 120   ;;  %vm1672_vm6 = vcmask (!%p2904_p4), 130112   ;;  %vm1903_vm7 = vcmask (!%p2904_p4), 195712   ;;  %vm2134_vm8 = vcmask (!%p2904_p4), 261312   ;;  %vm2361_vm9 = vcmask (!%p2904_p4), 523264  }
 0x109   : > { %vm1128_vm4 = vcmp.gt.s32.totalorder (!%p2904_p4), %v1127_v27, %v1125_v26  ;;  %s3566_s7 = smov (!%p2904_p4), 56   ;;  %s3567_s9 = smov (!%p2904_p4), 80  }
 0x10a   : > { %v1129_v28 = vsel (!%p2904_p4), %vm1128_vm4, -1e+30, %v3560_v7  ;;  %s3568_s4 = smov (!%p2904_p4), 112   ;;  %s3570_s27 = smov (!%p2904_p4), 72  }
 0x10b   : > { %3015 = vmatpush3.bf16.msra.mxu0 (!%p2904_p4), %v3258_v8  ;;  %s3571_s10 = smov (!%p2904_p4), 104   ;;  %s3572_s12 = smov (!%p2904_p4), 40  }
 0x10c   : > { %3026 = vmatprep.subr.bf16.mxu0 (!%p2904_p4), %v3560_v7  ;;  %s3573_s26 = smov (!%p2904_p4), 8   ;;  %p2496_p8 = scmp.eq.s32.totalorder (!%p2904_p4), %s3711_s20, 1 }
 0x10d   : > { %v2905_v29 = vld [vmem:[%s4426_s22] ss:$0 sm:$0xff]  ;;  %v2906_v32 = vld [vmem:[%s4426_s22 + $0x1] ss:$0 sm:$0xff] }
 0x10e   : > { %3017 = vmatmul.mubr.msk.bf16.vlgmr.msra.gmra.mrb[0].mxu0 %vm1170_vm2, %v1151_v11  ;;  %v4056_v30 = vadd.f32 %v2905_v29, %v1129_v28  ;;  %v4062_v38 = vadd.f32 %v2906_v32, %v1129_v28 }
 0x10f   : > { %3028 = vmatprep.mubr.msk.bf16.mxu0 %vm3561_vm1, %v3560_v7 }
 0x1e1   : > { %v1208_v13 = vpop.f32.mrb[0].mxu0 }
 0x1e2   : > { %v1209_v14 = vadd.f32 %v2907_v12, %v1208_v13  ;;  %v3018_v15 = vpop.f32.mrb[1].mxu0 }
 0x1e3   : > { %v1211_v16 = vpop.f32.mrb[2].mxu0 }
 0x1e4   : > { %v4034_v17 = vpack.c.bf16 %v1209_v14, %v1209_v14  ;;  %v1212_v18 = vadd.f32 %v2907_v12, %v1211_v16  ;;  %v3019_v19 = vpop.f32.mrb[3].mxu0 }
 0x1e6   : > { %1218 = vrot.lane.b32.xlu0 %v4034_v17, %s3562_s0  ;;  %v4037_v20 = vpack.c.bf16 %v1212_v18, %v1212_v18 }
 0x1ea   : > { %1268 = vrot.lane.b32.xlu0 %v4037_v20, %s3562_s0  ;;  %s3569_s0 = smov 48  }
 0x258   : > { %v1219_v21 = vpop.permute.xlu0 %1218 }
 0x259   : > { %v1225_v22 = vsel %vm1220_vm3, %v1219_v21, 0 }
 0x25a   : > { %3021 = vmatpush3.bf16.xpose.msra.mxu1 %v1225_v22 }
 0x25b   : > { %3032 = vmatprep.subr.bf16.mxu1 %v3560_v7 }
 0x25c   : > { %v1269_v23 = vpop.permute.xlu0 %1268 }
 0x25d   : > { %v1274_v24 = vsel %vm1220_vm3, %v1269_v23, 0 }
 0x25e   : > { %3027 = vmatpush3.bf16.xpose.msra.mxu0 %v1274_v24 }
 0x25f   : > { %3038 = vmatprep.subr.bf16.mxu0 %v3560_v7 }
 0x261   : > { %3023 = vmatmul.mubr.msk.bf16.vlgmr.msra.gmra.mrb[0].mxu1 %vm1220_vm3, %v4034_v17 }
 0x262   : > { %3034 = vmatprep.mubr.msk.bf16.mxu1 %vm3561_vm1, %v3560_v7 }
 0x265   : > { %3029 = vmatmul.mubr.msk.bf16.vlgmr.msra.gmra.mrb[4].mxu0 %vm1220_vm3, %v4037_v20 }
 0x266   : > { %3040 = vmatprep.mubr.msk.bf16.mxu0 %vm3561_vm1, %v3560_v7 }
 0x334   : > { %v1261_v31 = vpop.f32.mrb[0].mxu1 }
 0x335   : > { %v1316_v33 = vmul.f32 0.35355338, %v1261_v31  ;;  %v3024_v34 = vpop.f32.mrb[1].mxu1 }
 0x336   : > { %v1264_v35 = vpop.f32.mrb[2].mxu1 }
 0x337   : > { %v3025_v36 = vpop.f32.mrb[3].mxu1  ;;  %v1318_v37 = vadd.f32 %v1316_v33, %v4056_v30 }
 0x338   : > { %v1310_v39 = vpop.f32.mrb[4].mxu0 }
 0x339   : > { %v1317_v40 = vmul.f32 0.35355338, %v1310_v39  ;;  %v3030_v41 = vpop.f32.mrb[5].mxu0  ;;  %v1320_v42 = vsel %vm1220_vm3, %v1318_v37, -inf }
 0x33a   : > { %1321 = vmax.xlane.f32.xlu1 %v1320_v42  ;;  %v1313_v43 = vpop.f32.mrb[6].mxu0 }
 0x33b   : > { %v3031_v44 = vpop.f32.mrb[7].mxu0  ;;  %v1319_v45 = vadd.f32 %v1317_v40, %v4062_v38 }
 0x33d   : > { %v1323_v46 = vsel %vm1220_vm3, %v1319_v45, -inf }
 0x33e   : > { %1324 = vmax.xlane.f32.xlu1 %v1323_v46 }
 0x34f   : > { %1344 = vrot.lane.b32.xlu1 %v4034_v17, %s3563_s15 }
 0x353   : > { %1393 = vrot.lane.b32.xlu1 %v4037_v20, %s3563_s15  ;;  %s3574_s15 = smov 16  }
 0x357   : > { %1445 = vrot.lane.b32.xlu1 %v4034_v17, %s3564_s2 }
 0x3c7   : > { %v1322_v47 = vpop.xlane.xlu1 %1321 }
 0x3c8   : > { %v1326_v48 = vsub.f32 %v1318_v37, %v1322_v47 }
 0x3ca   : > { %v1328_v49 = vmul.f32 1.442695, %v1326_v48 }
 0x3cb   : > { %v1325_v50 = vpop.xlane.xlu1 %1324 }
 0x3cc   : > { %3267 = vpow2.f32 %v1328_v49  ;;  %v1327_v51 = vsub.f32 %v1319_v45, %v1325_v50 }
 0x3ce   : > { %v1330_v52 = vmul.f32 1.442695, %v1327_v51 }
 0x3cf   : > { %v1345_v53 = vpop.permute.xlu1 %1344 }
 0x3d0   : > { %3269 = vpow2.f32 %v1330_v52  ;;  %v1351_v54 = vsel %vm1349_vm5, %v1345_v53, 0 }
 0x3d1   : > { %3033 = vmatpush3.bf16.msra.mxu1 %v1351_v54 }
 0x3d2   : > { %3044 = vmatprep.subr.bf16.mxu1 %v3560_v7 }
 0x3d3   : > { %v1394_v55 = vpop.permute.xlu1 %1393 }
 0x3d4   : > { %v1399_v56 = vsel %vm1349_vm5, %v1394_v55, 0 }
 0x3d5   : > { %3039 = vmatpush3.bf16.msra.mxu0 %v1399_v56 }
 0x3d6   : > { %v3268_v57 = vpop.eup %3267  ;;  %3050 = vmatprep.subr.bf16.mxu0 %v3560_v7 }
 0x3d7   : > { %v1332_v58 = vsel %vm1220_vm3, %v3268_v57, 0.0  ;;  %v1446_v61 = vpop.permute.xlu1 %1445 }
 0x3d8   : > { %1333 = vadd.xlane.f32.xlu0 %v1332_v58  ;;  %v1451_v4 = vsel %vm1220_vm3, %v1446_v61, 0 }
 0x3da   : > { %v3270_v59 = vpop.eup %3269 }
 0x3db   : > { %v1335_v60 = vsel %vm1220_vm3, %v3270_v59, 0.0 }
 0x3dc   : > { %1336 = vadd.xlane.f32.xlu1 %v1335_v60 }
 0x3ed   : > { %1495 = vrot.lane.b32.xlu1 %v4037_v20, %s3564_s2  ;;  %s3575_s2 = smov 24  }
 0x3ee   : > { %1443 = vrot.lane.b32.xlu0 %v4034_v17, %s3565_s5 }
 0x3f1   : > { %1493 = vrot.lane.b32.xlu1 %v4037_v20, %s3565_s5 }
 0x465   : > { %v1334_v62 = vpop.xlane.xlu0 %1333 }
 0x466   : > { %3271 = vrcp.f32 %v1334_v62 }
 0x469   : > { %v1337_v63 = vpop.xlane.xlu1 %1336  ;;  %v1444_v12 = vpop.permute.xlu0 %1443 }
 0x46a   : > { %3273 = vrcp.f32 %v1337_v63 }
 0x46d   : > { %v1496_v6 = vpop.permute.xlu1 %1495 }
 0x46e   : > { %v1501_v11 = vsel %vm1220_vm3, %v1496_v6, 0 }
 0x470   : > { %v3272_v0 = vpop.eup %3271 }
 0x471   : > { %v1340_v1 = vmul.f32 %v3272_v0, %v3268_v57  ;;  %v1494_v13 = vpop.permute.xlu1 %1493 }
 0x473   : > { %v1342_v2 = vpack.c.bf16 %v1340_v1, %v1340_v1 }
 0x474   : > { %v3274_v3 = vpop.eup %3273 }
 0x475   : > { %v1341_v5 = vmul.f32 %v3274_v3, %v3270_v59  ;;  %3035 = vmatmul.mubr.msk.bf16.vlgmr.msra.gmra.mrb[4].mxu1 %vm1220_vm3, %v1342_v2 }
 0x476   : > { %3045 = vmatpush3.bf16.xpose.msra.mxu1 %v1451_v4  ;;  %3046 = vmatprep.mubr.msk.bf16.mxu1 %vm3561_vm1, %v3560_v7 }
 0x477   : > { %v1343_v8 = vpack.c.bf16 %v1341_v5, %v1341_v5  ;;  %3056 = vmatprep.subr.bf16.mxu1 %v3560_v7 }
 0x479   : > { %3041 = vmatmul.mubr.msk.bf16.vlgmr.msra.gmra.mrb[8].mxu0 %vm1220_vm3, %v1343_v8 }
 0x47a   : > { %3051 = vmatpush3.bf16.xpose.msra.mxu0 %v1501_v11  ;;  %3052 = vmatprep.mubr.msk.bf16.mxu0 %vm3561_vm1, %v3560_v7 }
 0x47b   : > { %3062 = vmatprep.subr.bf16.mxu0 %v3560_v7 }
 0x47d   : > { %3047 = vmatmul.mubr.msk.bf16.vlgmr.msra.gmra.mrb[8].mxu1 %vm1220_vm3, %v1444_v12 }
 0x47e   : > { %3058 = vmatprep.mubr.msk.bf16.mxu1 %vm3561_vm1, %v3560_v7 }
 0x481   : > { %3053 = vmatmul.mubr.msk.bf16.vlgmr.msra.gmra.mrb[12].mxu0 %vm1220_vm3, %v1494_v13 }
 0x482   : > { %3064 = vmatprep.mubr.msk.bf16.mxu0 %vm3561_vm1, %v3560_v7 }
 0x548   : > { %v1387_v14 = vpop.f32.mrb[4].mxu1 }
 0x549   : > { %v3036_v15 = vpop.f32.mrb[5].mxu1 }
 0x54a   : > { %v1390_v16 = vpop.f32.mrb[6].mxu1 }
 0x54b   : > { %v3037_v18 = vpop.f32.mrb[7].mxu1 }
 0x54c   : > { %v1435_v19 = vpop.f32.mrb[8].mxu0 }
 0x54d   : > { %v1441_v21 = vpack.c.bf16 %v1435_v19, %v1387_v14  ;;  %v3042_v22 = vpop.f32.mrb[9].mxu0 }
 0x54e   : > { %v1438_v23 = vpop.f32.mrb[10].mxu0 }
 0x54f   : > { %1442 = vst.msk [vmem:[#allocation3] sm:$0xff] %vm1220_vm3, %v1441_v21  ;;  %v3043_v24 = vpop.f32.mrb[11].mxu0 }
 0x550   : > { %v1487_v25 = vpop.f32.mrb[8].mxu1 }
 0x551   : > { %v1543_v26 = vmul.f32 0.35355338, %v1487_v25  ;;  %v3048_v27 = vpop.f32.mrb[9].mxu1 }
 0x552   : > { %v1490_v28 = vpop.f32.mrb[10].mxu1 }
 0x553   : > { %v3049_v29 = vpop.f32.mrb[11].mxu1  ;;  %v1545_v31 = vadd.f32 %v1543_v26, %v4056_v30 }
 0x554   : > { %v1537_v32 = vpop.f32.mrb[12].mxu0 }
 0x555   : > { %v1544_v33 = vmul.f32 0.35355338, %v1537_v32  ;;  %v3054_v34 = vpop.f32.mrb[13].mxu0  ;;  %v1547_v35 = vsel %vm1220_vm3, %v1545_v31, -inf }
 0x556   : > { %1548 = vmax.xlane.f32.xlu1 %v1547_v35  ;;  %v1540_v36 = vpop.f32.mrb[14].mxu0 }
 0x557   : > { %v3055_v37 = vpop.f32.mrb[15].mxu0  ;;  %v1546_v39 = vadd.f32 %v1544_v33, %v4062_v38 }
 0x559   : > { %v1550_v40 = vsel %vm1220_vm3, %v1546_v39, -inf }
 0x55a   : > { %1551 = vmax.xlane.f32.xlu0 %v1550_v40 }
 0x567   : > { %1571 = vrot.lane.b32.xlu1 %v4034_v17, %s3566_s7 }
 0x56b   : > { %1676 = vrot.lane.b32.xlu1 %v4034_v17, %s3567_s9 }
 0x570   : > { %1619 = vrot.lane.b32.xlu0 %v4037_v20, %s3566_s7 }
 0x574   : > { %1674 = vrot.lane.b32.xlu0 %v4034_v17, %s3568_s4 }
 0x5e3   : > { %v1549_v41 = vpop.xlane.xlu1 %1548 }
 0x5e4   : > { %v1553_v42 = vsub.f32 %v1545_v31, %v1549_v41 }
 0x5e6   : > { %v1555_v43 = vmul.f32 1.442695, %v1553_v42 }
 0x5e7   : > { %v1572_v44 = vpop.permute.xlu1 %1571  ;;  %v1552_v45 = vpop.xlane.xlu0 %1551 }
 0x5e8   : > { %3275 = vpow2.f32 %v1555_v43  ;;  %v1577_v46 = vsel %vm1349_vm5, %v1572_v44, 0  ;;  %v1554_v47 = vsub.f32 %v1546_v39, %v1552_v45 }
 0x5e9   : > { %3057 = vmatpush3.bf16.msra.mxu1 %v1577_v46 }
 0x5ea   : > { %v1557_v48 = vmul.f32 1.442695, %v1554_v47  ;;  %3068 = vmatprep.subr.bf16.mxu1 %v3560_v7 }
 0x5eb   : > { %v1620_v49 = vpop.permute.xlu0 %1619  ;;  %v1677_v55 = vpop.permute.xlu1 %1676 }
 0x5ec   : > { %3277 = vpow2.f32 %v1557_v48  ;;  %v1625_v50 = vsel %vm1349_vm5, %v1620_v49, 0  ;;  %v1682_v62 = vsel %vm1220_vm3, %v1677_v55, 0 }
 0x5ed   : > { %3063 = vmatpush3.bf16.msra.mxu0 %v1625_v50 }
 0x5ee   : > { %3074 = vmatprep.subr.bf16.mxu0 %v3560_v7 }
 0x5ef   : > { %v1675_v3 = vpop.permute.xlu0 %1674 }
 0x5f2   : > { %v3276_v51 = vpop.eup %3275 }
 0x5f3   : > { %v1559_v52 = vsel %vm1220_vm3, %v3276_v51, 0.0 }
 0x5f4   : > { %1560 = vadd.xlane.f32.xlu1 %v1559_v52 }
 0x5f6   : > { %v3278_v53 = vpop.eup %3277 }
 0x5f7   : > { %v1562_v54 = vsel %vm1220_vm3, %v3278_v53, 0.0 }
 0x5f8   : > { %1563 = vadd.xlane.f32.xlu1 %v1562_v54 }
 0x609   : > { %1726 = vrot.lane.b32.xlu1 %v4037_v20, %s3567_s9 }
 0x60d   : > { %1724 = vrot.lane.b32.xlu1 %v4037_v20, %s3568_s4 }
 0x681   : > { %v1561_v56 = vpop.xlane.xlu1 %1560 }
 0x682   : > { %3279 = vrcp.f32 %v1561_v56 }
 0x685   : > { %v1564_v57 = vpop.xlane.xlu1 %1563 }
 0x686   : > { %3281 = vrcp.f32 %v1564_v57 }
 0x689   : > { %v1727_v0 = vpop.permute.xlu1 %1726 }
 0x68a   : > { %v1732_v2 = vsel %vm1220_vm3, %v1727_v0, 0 }
 0x68c   : > { %v3280_v58 = vpop.eup %3279 }
 0x68d   : > { %v1567_v59 = vmul.f32 %v3280_v58, %v3276_v51  ;;  %v1725_v4 = vpop.permute.xlu1 %1724 }
 0x68f   : > { %v1569_v60 = vpack.c.bf16 %v1567_v59, %v1567_v59 }
 0x690   : > { %v3282_v61 = vpop.eup %3281 }
 0x691   : > { %v1568_v63 = vmul.f32 %v3282_v61, %v3278_v53  ;;  %3059 = vmatmul.mubr.msk.bf16.vlgmr.msra.gmra.mrb[12].mxu1 %vm1220_vm3, %v1569_v60 }
 0x692   : > { %3069 = vmatpush3.bf16.xpose.msra.mxu1 %v1682_v62  ;;  %3070 = vmatprep.mubr.msk.bf16.mxu1 %vm3561_vm1, %v3560_v7 }
 0x693   : > { %v1570_v1 = vpack.c.bf16 %v1568_v63, %v1568_v63  ;;  %3080 = vmatprep.subr.bf16.mxu1 %v3560_v7 }
 0x695   : > { %3065 = vmatmul.mubr.msk.bf16.vlgmr.msra.gmra.mrb[16].mxu0 %vm1220_vm3, %v1570_v1 }
 0x696   : > { %3075 = vmatpush3.bf16.xpose.msra.mxu0 %v1732_v2  ;;  %3076 = vmatprep.mubr.msk.bf16.mxu0 %vm3561_vm1, %v3560_v7 }
 0x697   : > { %3086 = vmatprep.subr.bf16.mxu0 %v3560_v7 }
 0x699   : > { %3071 = vmatmul.mubr.msk.bf16.vlgmr.msra.gmra.mrb[16].mxu1 %vm1220_vm3, %v1675_v3 }
 0x69a   : > { %3082 = vmatprep.mubr.msk.bf16.mxu1 %vm3561_vm1, %v3560_v7 }
 0x69d   : > { %3077 = vmatmul.mubr.msk.bf16.vlgmr.msra.gmra.mrb[20].mxu0 %vm1220_vm3, %v1725_v4 }
 0x69e   : > { %3088 = vmatprep.mubr.msk.bf16.mxu0 %vm3561_vm1, %v3560_v7 }
 0x764   : > { %v4128_v5 = vpop.f32.mrb[12].mxu1 }
 0x765   : > { %v3060_v6 = vpop.f32.mrb[13].mxu1 }
 0x766   : > { %v1616_v8 = vpop.f32.mrb[14].mxu1 }
 0x767   : > { %v3061_v11 = vpop.f32.mrb[15].mxu1 }
 0x768   : > { %v4130_v12 = vpop.f32.mrb[16].mxu0 }
 0x769   : > { %v1667_v13 = vpack.c.bf16 %v4130_v12, %v4128_v5  ;;  %v3066_v14 = vpop.f32.mrb[17].mxu0 }
 0x76a   : > { %v1664_v15 = vpop.f32.mrb[18].mxu0 }
 0x76b   : > { %v3067_v16 = vpop.f32.mrb[19].mxu0 }
 0x76c   : > { %v1718_v18 = vpop.f32.mrb[16].mxu1 }
 0x76d   : > { %v1774_v19 = vmul.f32 0.35355338, %v1718_v18  ;;  %v3072_v21 = vpop.f32.mrb[17].mxu1 }
 0x76e   : > { %v1721_v22 = vpop.f32.mrb[18].mxu1 }
 0x76f   : > { %v3073_v23 = vpop.f32.mrb[19].mxu1  ;;  %v1776_v24 = vadd.f32 %v1774_v19, %v4056_v30 }
 0x770   : > { %v1768_v25 = vpop.f32.mrb[20].mxu0 }
 0x771   : > { %v1775_v26 = vmul.f32 0.35355338, %v1768_v25  ;;  %v3078_v27 = vpop.f32.mrb[21].mxu0  ;;  %v1778_v28 = vsel %vm1220_vm3, %v1776_v24, -inf }
 0x772   : > { %1779 = vmax.xlane.f32.xlu0 %v1778_v28  ;;  %v1771_v29 = vpop.f32.mrb[22].mxu0 }
 0x773   : > { %v3079_v31 = vpop.f32.mrb[23].mxu0  ;;  %v1777_v32 = vadd.f32 %v1775_v26, %v4062_v38 }
 0x775   : > { %v1781_v33 = vsel %vm1220_vm3, %v1777_v32, -inf }
 0x776   : > { %1782 = vmax.xlane.f32.xlu1 %v1781_v33 }
 0x787   : > { %1802 = vrot.lane.b32.xlu1 %v4034_v17, %s3569_s0 }
 0x78b   : > { %1907 = vrot.lane.b32.xlu1 %v4034_v17, %s3570_s27 }
 0x78f   : > { %1957 = vrot.lane.b32.xlu1 %v4037_v20, %s3570_s27 }
 0x793   : > { %1955 = vrot.lane.b32.xlu1 %v4037_v20, %s3571_s10 }
 0x7ff   : > { %v1780_v34 = vpop.xlane.xlu0 %1779 }
 0x800   : > { %v1784_v35 = vsub.f32 %v1776_v24, %v1780_v34 }
 0x802   : > { %v1786_v36 = vmul.f32 1.442695, %v1784_v35 }
 0x803   : > { %v1783_v37 = vpop.xlane.xlu1 %1782 }
 0x804   : > { %3283 = vpow2.f32 %v1786_v36  ;;  %v1785_v39 = vsub.f32 %v1777_v32, %v1783_v37 }
 0x806   : > { %v1788_v40 = vmul.f32 1.442695, %v1785_v39 }
 0x807   : > { %v1803_v41 = vpop.permute.xlu1 %1802 }
 0x808   : > { %3285 = vpow2.f32 %v1788_v40  ;;  %v1808_v42 = vsel %vm1349_vm5, %v1803_v41, 0 }
 0x809   : > { %3081 = vmatpush3.bf16.msra.mxu1 %v1808_v42 }
 0x80a   : > { %3092 = vmatprep.subr.bf16.mxu1 %v3560_v7 }
 0x80b   : > { %v1908_v52 = vpop.permute.xlu1 %1907 }
 0x80c   : > { %v1913_v56 = vsel %vm1220_vm3, %v1908_v52, 0 }
 0x80e   : > { %v3284_v43 = vpop.eup %3283 }
 0x80f   : > { %v1790_v44 = vsel %vm1220_vm3, %v3284_v43, 0.0  ;;  %v1958_v58 = vpop.permute.xlu1 %1957 }
 0x810   : > { %1791 = vadd.xlane.f32.xlu0 %v1790_v44  ;;  %v1963_v60 = vsel %vm1220_vm3, %v1958_v58, 0 }
 0x812   : > { %v3286_v45 = vpop.eup %3285 }
 0x813   : > { %v1793_v46 = vsel %vm1220_vm3, %v3286_v45, 0.0  ;;  %v1956_v62 = vpop.permute.xlu1 %1955 }
 0x814   : > { %1794 = vadd.xlane.f32.xlu0 %v1793_v46 }
 0x82a   : > { %1850 = vrot.lane.b32.xlu0 %v4037_v20, %s3569_s0 }
 0x82e   : > { %1905 = vrot.lane.b32.xlu0 %v4034_v17, %s3571_s10 }
 0x89d   : > { %v1792_v47 = vpop.xlane.xlu0 %1791 }
 0x89e   : > { %3287 = vrcp.f32 %v1792_v47 }
 0x8a1   : > { %v1795_v48 = vpop.xlane.xlu0 %1794 }
 0x8a2   : > { %3289 = vrcp.f32 %v1795_v48 }
 0x8a5   : > { %v1851_v49 = vpop.permute.xlu0 %1850 }
 0x8a6   : > { %v1856_v50 = vsel %vm1349_vm5, %v1851_v49, 0  ;;  %v3259_v49 = vld [vmem:[%s3970_s23] sm:$0xff]  }
 0x8a7   : > { %3087 = vmatpush3.bf16.msra.mxu0 %v1856_v50  ;;  %v3260_v50 = vld [vmem:[%s3970_s23 + $0x8] sm:$0xff]   ;;  %s4427_s23 = scalar_lea.vmem [#allocation9], %s3939_s24 }
 0x8a8   : > { %v3288_v51 = vpop.eup %3287  ;;  %3098 = vmatprep.subr.bf16.mxu0 %v3560_v7 }
 0x8a9   : > { %v1798_v53 = vmul.f32 %v3288_v51, %v3284_v43  ;;  %v1906_v61 = vpop.permute.xlu0 %1905 }
 0x8ab   : > { %v1800_v54 = vpack.c.bf16 %v1798_v53, %v1798_v53 }
 0x8ac   : > { %v3290_v55 = vpop.eup %3289 }
 0x8ad   : > { %v1799_v57 = vmul.f32 %v3290_v55, %v3286_v45  ;;  %3083 = vmatmul.mubr.msk.bf16.vlgmr.msra.gmra.mrb[20].mxu1 %vm1220_vm3, %v1800_v54 }
 0x8ae   : > { %3093 = vmatpush3.bf16.xpose.msra.mxu1 %v1913_v56  ;;  %3094 = vmatprep.mubr.msk.bf16.mxu1 %vm3561_vm1, %v3560_v7 }
 0x8af   : > { %v1801_v59 = vpack.c.bf16 %v1799_v57, %v1799_v57  ;;  %3104 = vmatprep.subr.bf16.mxu1 %v3560_v7 }
 0x8b1   : > { %3089 = vmatmul.mubr.msk.bf16.vlgmr.msra.gmra.mrb[24].mxu0 %vm1220_vm3, %v1801_v59 }
 0x8b2   : > { %3099 = vmatpush3.bf16.xpose.msra.mxu0 %v1963_v60  ;;  %3100 = vmatprep.mubr.msk.bf16.mxu0 %vm3561_vm1, %v3560_v7 }
 0x8b3   : > { %3110 = vmatprep.subr.bf16.mxu0 %v3560_v7 }
 0x8b5   : > { %3095 = vmatmul.mubr.msk.bf16.vlgmr.msra.gmra.mrb[24].mxu1 %vm1220_vm3, %v1906_v61 }
 0x8b6   : > { %3106 = vmatprep.mubr.msk.bf16.mxu1 %vm3561_vm1, %v3560_v7 }
 0x8b9   : > { %3101 = vmatmul.mubr.msk.bf16.vlgmr.msra.gmra.mrb[28].mxu0 %vm1220_vm3, %v1956_v62  ;;  %v2927_v62 = vld [vmem:[%s4427_s23] ss:$0 sm:$0xff] }
 0x8ba   : > { %3112 = vmatprep.mubr.msk.bf16.mxu0 %vm3561_vm1, %v3560_v7 }
 0x980   : > { %v1844_v63 = vpop.f32.mrb[20].mxu1 }
 0x981   : > { %v3084_v0 = vpop.f32.mrb[21].mxu1 }
 0x982   : > { %v1847_v1 = vpop.f32.mrb[22].mxu1 }
 0x983   : > { %v3085_v2 = vpop.f32.mrb[23].mxu1 }
 0x984   : > { %v1892_v3 = vpop.f32.mrb[24].mxu0 }
 0x985   : > { %v1898_v4 = vpack.c.bf16 %v1892_v3, %v1844_v63  ;;  %v3090_v6 = vpop.f32.mrb[25].mxu0 }
 0x986   : > { %v1895_v8 = vpop.f32.mrb[26].mxu0 }
 0x987   : > { %v3091_v11 = vpop.f32.mrb[27].mxu0 }
 0x988   : > { %v1949_v14 = vpop.f32.mrb[24].mxu1 }
 0x989   : > { %v2005_v15 = vmul.f32 0.35355338, %v1949_v14  ;;  %v3096_v16 = vpop.f32.mrb[25].mxu1 }
 0x98a   : > { %v1952_v18 = vpop.f32.mrb[26].mxu1 }
 0x98b   : > { %v3097_v19 = vpop.f32.mrb[27].mxu1  ;;  %v2007_v21 = vadd.f32 %v2005_v15, %v4056_v30 }
 0x98c   : > { %v1999_v22 = vpop.f32.mrb[28].mxu0 }
 0x98d   : > { %v2006_v23 = vmul.f32 0.35355338, %v1999_v22  ;;  %v3102_v24 = vpop.f32.mrb[29].mxu0  ;;  %v2009_v25 = vsel %vm1220_vm3, %v2007_v21, -inf }
 0x98e   : > { %2010 = vmax.xlane.f32.xlu0 %v2009_v25  ;;  %v2002_v26 = vpop.f32.mrb[30].mxu0  ;;  %v3261_v25 = vld [vmem:[%s3975_s14] sm:$0xff]  }
 0x98f   : > { %v3103_v27 = vpop.f32.mrb[31].mxu0  ;;  %v2008_v28 = vadd.f32 %v2006_v23, %v4062_v38  ;;  %v3262_v26 = vld [vmem:[%s3975_s14 + $0x8] sm:$0xff]  }
 0x990   : > { %v3263_v27 = vld [vmem:[%s3980_s8] sm:$0xff]  }
 0x991   : > { %v2012_v29 = vsel %vm1220_vm3, %v2008_v28, -inf }
 0x992   : > { %2013 = vmax.xlane.f32.xlu1 %v2012_v29 }
 0x9a3   : > { %2033 = vrot.lane.b32.xlu1 %v4034_v17, %s3572_s12 }
 0x9a7   : > { %1669 = vrot.lane.b32.xlu1 %v1667_v13, %s3573_s26 }
 0x9ab   : > { %1900 = vrot.lane.b32.xlu1 %v1898_v4, %s3574_s15 }
 0xa1b   : > { %v2011_v30 = vpop.xlane.xlu0 %2010 }
 0xa1c   : > { %v2015_v31 = vsub.f32 %v2007_v21, %v2011_v30 }
 0xa1e   : > { %v2017_v32 = vmul.f32 1.442695, %v2015_v31 }
 0xa1f   : > { %v2014_v33 = vpop.xlane.xlu1 %2013 }
 0xa20   : > { %3291 = vpow2.f32 %v2017_v32  ;;  %v2016_v34 = vsub.f32 %v2008_v28, %v2014_v33  ;;  %v3264_v28 = vld [vmem:[%s3980_s8 + $0x8] sm:$0xff]  }
 0xa22   : > { %v2019_v38 = vmul.f32 1.442695, %v2016_v34 }
 0xa23   : > { %v2034_v35 = vpop.permute.xlu1 %2033 }
 0xa24   : > { %3293 = vpow2.f32 %v2019_v38  ;;  %v2039_v36 = vsel %vm1349_vm5, %v2034_v35, 0  ;;  %v2931_v35 = vld [vmem:[%s1069_s21] ss:$0 sm:$0xff]  ;;  %s4430_s21 = scalar_lea.vmem [#allocation10], %s3939_s24 }
 0xa25   : > { %3105 = vmatpush3.bf16.msra.mxu1 %v2039_v36 }
 0xa26   : > { %3116 = vmatprep.subr.bf16.mxu1 %v3560_v7 }
 0xa27   : > { %v1670_v17 = vpop.permute.xlu1 %1669 }
 0xa28   : > { %1673 = vst.msk [vmem:[#allocation3] sm:$0xff] %vm1672_vm6, %v1670_v17 }
 0xa2a   : > { %v3292_v5 = vpop.eup %3291 }
 0xa2b   : > { %v1901_v12 = vpop.permute.xlu1 %1900  ;;  %v2021_v13 = vsel %vm1220_vm3, %v3292_v5, 0.0 }
 0xa2c   : > { %1904 = vst.msk [vmem:[#allocation3] sm:$0xff] %vm1903_vm7, %v1901_v12  ;;  %2022 = vadd.xlane.f32.xlu0 %v2021_v13  ;;  %v2932_v13 = vld [vmem:[%s1076_s3] ss:$0 sm:$0xff] }
 0xa2e   : > { %v3294_v37 = vpop.eup %3293 }
 0xa2f   : > { %v2024_v39 = vsel %vm1220_vm3, %v3294_v37, 0.0 }
 0xa30   : > { %2025 = vadd.xlane.f32.xlu0 %v2024_v39 }
 0xa46   : > { %2081 = vrot.lane.b32.xlu0 %v4037_v20, %s3572_s12  ;;  %s4433_s12 = sld [smem:[#allocation42_spill]] }
 0xab9   : > { %v2023_v40 = vpop.xlane.xlu0 %2022 }
 0xaba   : > { %3295 = vrcp.f32 %v2023_v40 }
 0xabd   : > { %v2026_v41 = vpop.xlane.xlu0 %2025 }
 0xabe   : > { %3297 = vrcp.f32 %v2026_v41 }
 0xac1   : > { %v2082_v42 = vpop.permute.xlu0 %2081 }
 0xac2   : > { %v2087_v43 = vsel %vm1349_vm5, %v2082_v42, 0  ;;  %v3265_v42 = vld [vmem:[%s3980_s8 + $0x10] sm:$0xff]  }
 0xac3   : > { %3111 = vmatpush3.bf16.msra.mxu0 %v2087_v43  ;;  %v3266_v43 = vld [vmem:[%s3980_s8 + $0x18] sm:$0xff]  }
 0xac4   : > { %v3296_v44 = vpop.eup %3295  ;;  %3124 = vmatprep.subr.bf16.mxu0 %v3560_v7 }
 0xac5   : > { %v2029_v45 = vmul.f32 %v3296_v44, %v3292_v5  ;;  %v2933_v44 = vld [vmem:[%s4430_s21] ss:$0 sm:$0xff] }
 0xac7   : > { %v2031_v46 = vpack.c.bf16 %v2029_v45, %v2029_v45 }
 0xac8   : > { %v3298_v47 = vpop.eup %3297 }
 0xac9   : > { %v2030_v48 = vmul.f32 %v3298_v47, %v3294_v37  ;;  %3107 = vmatmul.mubr.msk.bf16.vlgmr.msra.gmra.mrb[28].mxu1 %vm1220_vm3, %v2031_v46 }
 0xaca   : > { %3120 = vmatprep.mubr.msk.bf16.mxu1 %vm3561_vm1, %v3560_v7  ;;  %3117 = vmatpush3.bf16.msra.mxu1 %v3259_v49 }
 0xacb   : > { %v2032_v20 = vpack.c.bf16 %v2030_v48, %v2030_v48  ;;  %3118 = vmatprep.subr.bf16.mxu1 %v3560_v7 }
 0xacd   : > { %3113 = vmatmul.mubr.msk.bf16.vlgmr.msra.gmra.mrb[32].mxu0 %vm1220_vm3, %v2032_v20 }
 0xace   : > { %3128 = vmatprep.mubr.msk.bf16.mxu0 %vm3561_vm1, %v3560_v7  ;;  %3119 = vmatpush3.bf16.msra.mxu1 %v3260_v50 }
 0xacf   : > { %3132 = vmatprep.subr.bf16.mxu1 %v3560_v7  ;;  %3125 = vmatpush3.bf16.msra.mxu0 %v3261_v25  ;;  %v2944_v25 = vld [vmem:[%s1090_s6] ss:$0 sm:$0xff]  ;;  %s2497_s6 = scalar_select %p2496_p8, 1, 0 }
 0xad0   : > { %3126 = vmatprep.subr.bf16.mxu0 %v3560_v7 }
 0xad3   : > { %3127 = vmatpush3.bf16.msra.mxu0 %v3262_v26 }
 0xb9c   : > { %v2075_v51 = vpop.f32.mrb[28].mxu1 }
 0xb9d   : > { %v3108_v52 = vpop.f32.mrb[29].mxu1 }
 0xb9e   : > { %v2078_v53 = vpop.f32.mrb[30].mxu1 }
 0xb9f   : > { %v3109_v54 = vpop.f32.mrb[31].mxu1  ;;  %v2937_v53 = vld [vmem:[%s892_s18] ss:$0 sm:$0xff] }
 0xba0   : > { %v2123_v55 = vpop.f32.mrb[32].mxu0 }
 0xba1   : > { %v2129_v56 = vpack.c.bf16 %v2123_v55, %v2075_v51  ;;  %v3114_v57 = vpop.f32.mrb[33].mxu0 }
 0xba2   : > { %v2126_v58 = vpop.f32.mrb[34].mxu0 }
 0xba3   : > { %2131 = vrot.lane.b32.xlu0 %v2129_v56, %s3575_s2  ;;  %v3115_v59 = vpop.f32.mrb[35].mxu0  ;;  %s4434_s2 = sld [smem:[#allocation43_spill]] }
 0xc15   : > { %v2132_v60 = vpop.permute.xlu0 %2131 }
 0xc16   : > { %2135 = vst.msk [vmem:[#allocation3] sm:$0xff] %vm2134_vm8, %v2132_v60 }
 0xc1d   : > { %v2136_v61 = vld [vmem:[#allocation3] sm:$0xff] }
 0xc1e   : > { %3121 = vmatmul.mubr.msk.bf16.vlgmr.msra.gmra.mrb[32].mxu1 %vm1170_vm2, %v2136_v61 }
 0xc1f   : > { %3140 = vmatprep.mubr.msk.bf16.mxu1 %vm3561_vm1, %v3560_v7  ;;  %3133 = vmatpush3.bf16.msra.mxu1 %v3263_v27 }
 0xc20   : > { %3134 = vmatprep.subr.bf16.mxu1 %v3560_v7 }
 0xc23   : > { %3135 = vmatpush3.bf16.msra.mxu1 %v3264_v28 }
 0xc24   : > { %3136 = vmatprep.subr.bf16.mxu1 %v3560_v7 }
 0xc27   : > { %3137 = vmatpush3.bf16.msra.mxu1 %v3265_v42 }
 0xc28   : > { %3138 = vmatprep.subr.bf16.mxu1 %v3560_v7 }
 0xc2b   : > { %3139 = vmatpush3.bf16.msra.mxu1 %v3266_v43 }
 0xcf1   : > { %v2197_v63 = vpop.f32.mrb[32].mxu1 }
 0xcf2   : > { %v2198_v0 = vadd.f32 %v2927_v62, %v2197_v63  ;;  %v3122_v1 = vpop.f32.mrb[33].mxu1 }
 0xcf3   : > { %v2200_v2 = vpop.f32.mrb[34].mxu1 }
 0xcf4   : > { %v2201_v3 = vadd.f32 %v2927_v62, %v2200_v2  ;;  %v3123_v4 = vpop.f32.mrb[35].mxu1  ;;  %v2204_v6 = vadd.f32 %v2198_v0, %v4019_v9 }
 0xcf6   : > { %v2208_v8 = vsel %vm1170_vm2, %v2204_v6, 0.0  ;;  %v2205_v11 = vadd.f32 %v2201_v3, %v4021_v10 }
 0xcf7   : > { %2209 = vadd.xlane.f32.xlu1 %v2208_v8 }
 0xcf8   : > { %v2211_v14 = vsel %vm1170_vm2, %v2205_v11, 0.0 }
 0xcf9   : > { %2212 = vadd.xlane.f32.xlu0 %v2211_v14 }
 0xd84   : > { %v2210_v15 = vpop.xlane.xlu1 %2209 }
 0xd85   : > { %v2215_v16 = vmul.f32 0.03125, %v2210_v15 }
 0xd86   : > { %v2213_v18 = vpop.xlane.xlu0 %2212 }
 0xd87   : > { %v2217_v19 = vsub.f32 %v2204_v6, %v2215_v16  ;;  %v2216_v21 = vmul.f32 0.03125, %v2213_v18 }
 0xd89   : > { %v2218_v22 = vsub.f32 %v2205_v11, %v2216_v21  ;;  %v2219_v23 = vmul.f32 %v2217_v19, %v2217_v19 }
 0xd8b   : > { %v2221_v9 = vsel %vm1170_vm2, %v2219_v23, 0.0  ;;  %v2220_v24 = vmul.f32 %v2218_v22, %v2218_v22 }
 0xd8c   : > { %2222 = vadd.xlane.f32.xlu0 %v2221_v9  ;;  %v2943_v9 = vld [vmem:[%s1083_s29] ss:$0 sm:$0xff] }
 0xd8d   : > { %v2224_v10 = vsel %vm1170_vm2, %v2220_v24, 0.0 }
 0xd8e   : > { %2225 = vadd.xlane.f32.xlu1 %v2224_v10 }
 0xe19   : > { %v2223_v29 = vpop.xlane.xlu0 %2222 }
 0xe1a   : > { %v2227_v30 = vmul.f32 0.03125, %v2223_v29 }
 0xe1b   : > { %v2226_v31 = vpop.xlane.xlu1 %2225 }
 0xe1c   : > { %v2229_v32 = vadd.f32 1e-05, %v2227_v30  ;;  %v2228_v33 = vmul.f32 0.03125, %v2226_v31 }
 0xe1e   : > { %3299 = vrsqrt.f32 %v2229_v32  ;;  %v2230_v34 = vadd.f32 1e-05, %v2228_v33 }
 0xe20   : > { %3301 = vrsqrt.f32 %v2230_v34 }
 0xe28   : > { %v3300_v38 = vpop.eup %3299 }
 0xe29   : > { %v2233_v36 = vmul.f32 %v3300_v38, %v2217_v19 }
 0xe2a   : > { %v3302_v17 = vpop.eup %3301 }
 0xe2b   : > { %v2241_v5 = vmul.f32 %v2931_v35, %v2233_v36  ;;  %v2234_v12 = vmul.f32 %v3302_v17, %v2218_v22 }
 0xe2d   : > { %v2242_v37 = vmul.f32 %v2931_v35, %v2234_v12  ;;  %v2249_v39 = vadd.f32 %v2932_v13, %v2241_v5 }
 0xe2f   : > { %v2250_v40 = vadd.f32 %v2932_v13, %v2242_v37 }
 0xe31   : > { %v2256_v41 = vpack.c.bf16 %v2250_v40, %v2249_v39 }
 0xe33   : > { %3129 = vmatmul.mubr.msk.bf16.vlgmr.msra.gmra.mrb[36].mxu0 %vm1170_vm2, %v2256_v41 }
 0xf06   : > { %v2312_v45 = vpop.f32.mrb[36].mxu0 }
 0xf07   : > { %v2313_v46 = vadd.f32 %v2933_v44, %v2312_v45  ;;  %v3130_v47 = vpop.f32.mrb[37].mxu0 }
 0xf08   : > { %v2315_v48 = vpop.f32.mrb[38].mxu0  ;;  %v2498_v47 = vstv %s2497_s6 }
 0xf09   : > { %v2316_v20 = vadd.f32 %v2933_v44, %v2315_v48  ;;  %v3131_v49 = vpop.f32.mrb[39].mxu0  ;;  %v2319_v50 = vmax.f32 %v2313_v46, 0.0  ;;  %v2945_v46 = vld [vmem:[%s4433_s12] ss:$0 sm:$0xff]  ;;  %vm2499_vm10 = vcmp.eq.s32.totalorder %v2498_v47, 1 }
 0xf0a   : > { %v2946_v49 = vld [vmem:[%s4434_s2] ss:$0 sm:$0xff] }
 0xf0b   : > { %v2320_v51 = vmax.f32 %v2316_v20, 0.0 }
 0xf0d   : > { %v2330_v52 = vpack.c.bf16 %v2320_v51, %v2319_v50 }
 0xf0f   : > { %3141 = vmatmul.mubr.msk.bf16.vlgmr.msra.gmra.mrb[36].mxu1 %vm2361_vm9, %v2330_v52 }
 0xfe2   : > { %v2399_v54 = vpop.f32.mrb[36].mxu1 }
 0xfe3   : > { %v2400_v55 = vadd.f32 %v2937_v53, %v2399_v54  ;;  %v3142_v7 = vpop.f32.mrb[37].mxu1 }
 0xfe4   : > { %v2402_v56 = vpop.f32.mrb[38].mxu1 }
 0xfe5   : > { %v2403_v57 = vadd.f32 %v2937_v53, %v2402_v56  ;;  %v3143_v58 = vpop.f32.mrb[39].mxu1  ;;  %v2406_v59 = vadd.f32 %v2400_v55, %v2249_v39 }
 0xfe7   : > { %v2410_v60 = vsel %vm1170_vm2, %v2406_v59, 0.0  ;;  %v2407_v61 = vadd.f32 %v2403_v57, %v2250_v40 }
 0xfe8   : > { %2411 = vadd.xlane.f32.xlu0 %v2410_v60 }
 0xfe9   : > { %v2413_v62 = vsel %vm1170_vm2, %v2407_v61, 0.0 }
 0xfea   : > { %2414 = vadd.xlane.f32.xlu1 %v2413_v62 }
0x1075   : > { %v2412_v63 = vpop.xlane.xlu0 %2411 }
0x1076   : > { %v2416_v0 = vmul.f32 0.03125, %v2412_v63 }
0x1077   : > { %v2415_v1 = vpop.xlane.xlu1 %2414 }
0x1078   : > { %v2418_v2 = vsub.f32 %v2406_v59, %v2416_v0  ;;  %v2417_v3 = vmul.f32 0.03125, %v2415_v1 }
0x107a   : > { %v2419_v4 = vsub.f32 %v2407_v61, %v2417_v3  ;;  %v2420_v6 = vmul.f32 %v2418_v2, %v2418_v2 }
0x107c   : > { %v2422_v8 = vsel %vm1170_vm2, %v2420_v6, 0.0  ;;  %v2421_v11 = vmul.f32 %v2419_v4, %v2419_v4 }
0x107d   : > { %2423 = vadd.xlane.f32.xlu0 %v2422_v8 }
0x107e   : > { %v2425_v14 = vsel %vm1170_vm2, %v2421_v11, 0.0 }
0x107f   : > { %2426 = vadd.xlane.f32.xlu1 %v2425_v14 }
0x110a   : > { %v2424_v15 = vpop.xlane.xlu0 %2423 }
0x110b   : > { %v2428_v16 = vmul.f32 0.03125, %v2424_v15 }
0x110c   : > { %v2427_v18 = vpop.xlane.xlu1 %2426 }
0x110d   : > { %v2430_v19 = vadd.f32 1e-05, %v2428_v16  ;;  %v2429_v21 = vmul.f32 0.03125, %v2427_v18 }
0x110f   : > { %3303 = vrsqrt.f32 %v2430_v19  ;;  %v2431_v22 = vadd.f32 1e-05, %v2429_v21 }
0x1111   : > { %3305 = vrsqrt.f32 %v2431_v22 }
0x1119   : > { %v3304_v23 = vpop.eup %3303 }
0x111a   : > { %v2434_v24 = vmul.f32 %v3304_v23, %v2418_v2 }
0x111b   : > { %v3306_v10 = vpop.eup %3305 }
0x111c   : > { %v2442_v26 = vmul.f32 %v2943_v9, %v2434_v24  ;;  %v2435_v27 = vmul.f32 %v3306_v10, %v2419_v4 }
0x111e   : > { %v2450_v28 = vadd.f32 %v2944_v25, %v2442_v26  ;;  %v2443_v29 = vmul.f32 %v2943_v9, %v2435_v27 }
0x1120   : > { %v2454_v30 = vsel %vm1170_vm2, %v2450_v28, 0.0  ;;  %v2451_v31 = vadd.f32 %v2944_v25, %v2443_v29 }
0x1121   : > { %2455 = vadd.xlane.f32.xlu0 %v2454_v30 }
0x1122   : > { %v2457_v32 = vsel %vm1170_vm2, %v2451_v31, 0.0 }
0x1123   : > { %2458 = vadd.xlane.f32.xlu1 %v2457_v32 }
0x11ae   : > { %v2456_v33 = vpop.xlane.xlu0 %2455 }
0x11af   : > { %v2460_v34 = vmul.f32 0.03125, %v2456_v33 }
0x11b0   : > { %v2459_v38 = vpop.xlane.xlu1 %2458 }
0x11b1   : > { %v2462_v35 = vsub.f32 %v2450_v28, %v2460_v34  ;;  %v2461_v36 = vmul.f32 0.03125, %v2459_v38 }
0x11b3   : > { %v2463_v17 = vsub.f32 %v2451_v31, %v2461_v36  ;;  %v2464_v5 = vmul.f32 %v2462_v35, %v2462_v35 }
0x11b5   : > { %v2466_v12 = vsel %vm1170_vm2, %v2464_v5, 0.0  ;;  %v2465_v13 = vmul.f32 %v2463_v17, %v2463_v17 }
0x11b6   : > { %2467 = vadd.xlane.f32.xlu0 %v2466_v12 }
0x11b7   : > { %v2469_v37 = vsel %vm1170_vm2, %v2465_v13, 0.0 }
0x11b8   : > { %2470 = vadd.xlane.f32.xlu1 %v2469_v37 }
0x1243   : > { %v2468_v39 = vpop.xlane.xlu0 %2467 }
0x1244   : > { %v2472_v40 = vmul.f32 0.03125, %v2468_v39 }
0x1245   : > { %v2471_v41 = vpop.xlane.xlu1 %2470 }
0x1246   : > { %v2474_v42 = vadd.f32 1e-05, %v2472_v40  ;;  %v2473_v43 = vmul.f32 0.03125, %v2471_v41 }
0x1248   : > { %3307 = vrsqrt.f32 %v2474_v42  ;;  %v2475_v44 = vadd.f32 1e-05, %v2473_v43 }
0x124a   : > { %3309 = vrsqrt.f32 %v2475_v44 }
0x1252   : > { %v3308_v45 = vpop.eup %3307 }
0x1253   : > { %v2478_v48 = vmul.f32 %v3308_v45, %v2462_v35 }
0x1254   : > { %v3310_v20 = vpop.eup %3309 }
0x1255   : > { %v2486_v50 = vmul.f32 %v2945_v46, %v2478_v48  ;;  %v2479_v51 = vmul.f32 %v3310_v20, %v2463_v17 }
0x1257   : > { %v2494_v52 = vadd.f32 %v2946_v49, %v2486_v50  ;;  %v2487_v53 = vmul.f32 %v2945_v46, %v2479_v51 }
0x1259   : > { %v2500_v54 = vsel %vm2499_vm10, %v2494_v52, %v2450_v28  ;;  %v2495_v55 = vadd.f32 %v2946_v49, %v2487_v53 }
0x125a   : > { %2502 = vst.msk [vmem:[#allocation2] sm:$0xff] %vm1170_vm2, %v2500_v54 }
0x125b   : > { %v2501_v7 = vsel %vm2499_vm10, %v2495_v55, %v2451_v31 }
0x125c   : > { %2503 = vst.msk [vmem:[#allocation2 + $0x8] sm:$0xff] %vm1170_vm2, %v2501_v7 }
0x125d PF: > { %p2947_p5 = scmp.lt.s32.totalorder %s3711_s20, 2 }
0x125e   : > { %v3311_v56 = vld [vmem:[%s900_s16] sm:$0xff] (!%p2947_p5)   ;;  %v3576_v57 = vmov (!%p2947_p5), 0.0   ;;  %v3312_v58 = vld [vmem:[%s900_s16 + $0x8] sm:$0xff] (!%p2947_p5)   ;;  %vm3577_vm11 = vmmov (!%p2947_p5), 0   ;;  %vm2534_vm12 = vcmask (!%p2947_p5), 261120  }
0x125f   : > { %2507 = sbr.rel (%p2947_p5) target bundleno = 4928 (0x1340), region = 165  ;;  %3144 = vmatprep.subr.bf16.mxu0 (!%p2947_p5), %v3576_v57  ;;  %3148 = vmatprep.mubr.msk.bf16.mxu0 (!%p2947_p5), %vm3577_vm11, %v3576_v57  ;;  %v2948_v62 = vld [vmem:[%s1101_s30] ss:$0 sm:$0xff] (!%p2947_p5) }
0x1260   : > { %3145 = vmatpush3.bf16.msra.mxu0 (!%p2947_p5), %v3311_v56 }
0x1261   : > { %v2508_v59 = vld [vmem:[#allocation2] sm:$0xff] (!%p2947_p5)  ;;  %3146 = vmatprep.subr.bf16.mxu0 (!%p2947_p5), %v3576_v57 }
0x1263   : > { %v2509_v60 = vld [vmem:[#allocation2 + $0x8] sm:$0xff] (!%p2947_p5) }
0x1264   : > { %v2515_v61 = vpack.c.bf16 (!%p2947_p5), %v2509_v60, %v2508_v59  ;;  %3147 = vmatpush3.bf16.msra.mxu0 (!%p2947_p5), %v3312_v58 }
0x1267   : > { %3149 = vmatmul.mubr.msk.bf16.vlgmr.msra.gmra.mrb[0].mxu0 %vm2534_vm12, %v2515_v61 }
0x133a   : > { %v2572_v63 = vpop.f32.mrb[0].mxu0 }
0x133b   : > { %v2573_v0 = vadd.f32 %v2948_v62, %v2572_v63  ;;  %v3150_v1 = vpop.f32.mrb[1].mxu0 }
0x133c   : > { %v2575_v2 = vpop.f32.mrb[2].mxu0 }
0x133d   : > { %2579 = vst [vmem:[%s4010_s25] sm:$0xff] %v2573_v0  ;;  %v2576_v3 = vadd.f32 %v2948_v62, %v2575_v2  ;;  %v3151_v4 = vpop.f32.mrb[3].mxu0 }
0x133f   : > { %2580 = vst [vmem:[%s4010_s25 + $0x8] sm:$0xff] %v2576_v3 }
0x1340 PF: > { %s4436_s11 = sld [smem:[#allocation25_spill]]  ;;  %s2954_s16 = sshll.u32 %s4456_s19, 7 }
0x1341   : > { %s4437_s9 = sld [smem:[#allocation46_spill]]  ;;  %s2597_s13 = sshll.u32 %s4010_s25, 4  ;;  %s4273_s13 = int_to_ptr.vmem [resolvable:$true] %s2597_s13 }
0x1342   : > { %s4438_s30 = sand.u32 1, %s3531_s28   ;;  %s3453_s21 = scalar_lea.vmem %s4273_s13, 256 }
0x1343   : > { %s4277_s0 = scalar_lea.sflag [#allocation6], %s4438_s30  ;;  %p3454_p11 = scmp.ne.s32.totalorder %s4273_s13, %s3453_s21 }
0x1344   : > { %s3578_s19 = smov [#allocation14]  }
0x1345   : > { %s3457_s24 = sshll.u32 %s3578_s19, 4  ;;  %s3458_s24 = int_to_ptr.vmem [resolvable:$false] %s3457_s24 }
0x1346   : > { %p4439_p1 = scmp.ne.s32.totalorder %s4436_s11, 0  ;;  %s3459_s8 = scalar_lea.vmem %s3458_s24, 512 }
0x1347   : > { %s4270_s4 = scalar_lea.hbm %s4437_s9, %s2954_s16  ;;  %p3460_p6 = scmp.lt.s32.totalorder %s4273_s13, %s3458_s24 }
0x1348   : > { %p3455_p12 = pnand %p3454_p11, %p4439_p1  ;;  %p3461_p9 = scmp.lt.s32.totalorder %s3459_s8, %s3453_s21 }
0x134a   : > { %p3456_p7 = pneg %p3455_p12  ;;  %p3462_p0 = por %p3461_p9, %p3460_p6 }
0x134c   : > { %p3463_p13 = pnand %p3462_p0, %p3456_p7 }
0x134e   : > { %3466 = shalt.err (!%p3463_p13)
}
0x134f   : > { %s3467_s25 = scalar_lea.hbm %s4270_s4, 256  ;;  %s3471_s27 = scalar_lea.hbm %s4437_s9, 512 }
0x1350   : > { %p3468_p3 = scmp.ne.s32.totalorder %s4270_s4, %s3467_s25  ;;  %p3472_p4 = scmp.lt.u32.totalorder %s4270_s4, %s4437_s9 }
0x1351   : > { %p3473_p8 = scmp.lt.u32.totalorder %s3471_s27, %s3467_s25  ;;  %p3475_p11 = scmp.lt.u32.totalorder %s3467_s25, %s4270_s4 }
0x1352   : > { %p3469_p2 = pnand %p3468_p3, %p4439_p1 }
0x1353   : > { %p3474_p5 = por %p3473_p8, %p3472_p4 }
0x1354   : > { %p3470_p10 = pneg %p3469_p2 }
0x1355   : > { %p3476_p12 = por %p3475_p11, %p3474_p5 }
0x1357   : > { %p3477_p7 = pnand %p3476_p12, %p3470_p10 }
0x1359   : > { %3480 = shalt.err (!%p3477_p7)
}
0x135a   : > { %s3579_s29 = smov 128   ;;  %s3580_s17 = smov 256  }
0x135b   : > { %s3581_s12 = smov 8  }
0x135c   : > { %3164 = dma.vmem_to_hbm [thread:$0]  (%p4439_p1), %s4273_s13, 256, %s4270_s4, %s4277_s0, %s3579_s29, %s3580_s17, %s3581_s12  }
0x135d PF: > { %s4440_s26 = sld [smem:[#allocation19_spill]]  ;;  %s4441_s15 = sld [smem:[#allocation27_spill]] }
0x135e   : > { %p3176_p6 = scmp.ge.s32.totalorder %s3551_s1, 2 }
0x1363   : > { %s2612_s2 = sand.u32 1, %s4440_s26   ;;  %p4442_p9 = scmp.ne.s32.totalorder %s4441_s15, 0 }
0x1364   : > { %s2613_s20 = scalar_lea.sflag [#allocation6], %s2612_s2 }
0x1365   : > { %p3171_p0 = pnand %p3176_p6, %p4442_p9 }
0x1367   : > { %3522 = dma.done.wait (!%p3171_p0), %s2613_s20, 256  }
0x1368   : > { %3524 = vsyncadd (!%p3171_p0), %s2613_s20, 4294967040  ;;  %s4443_s1 = sld [smem:[#allocation23_spill]]  ;;  %s4444_s23 = sld [smem:[#allocation20_spill]] }
0x1369   : > { %s4445_s29 = sld [smem:[#allocation26_spill]]  ;;  %s4446_s30 = sld [smem:[#allocation21_spill]] }
0x136a   : > { %s4447_s0 = sld [smem:[#allocation22_spill]]  ;;  %s4448_s19 = sld [smem:[#allocation24_spill]] }
0x136b   : > { %s4449_s27 = smov %s3531_s28 }
0x136e   : > { %p35_p1 = scmp.ge.s32.totalorder %s4443_s1, 6   ;;  %s4450_s28 = smov %s4444_s23 }
0x1370   :  { %37 = sbr.rel (!%p35_p1) target bundleno = 30 (0x1e), region = 265 }
0x1377   :  { %2618 = vsyncpa [#allocation5], 1 }
0x1378   :  { %2620 = vsyncpa [#allocation5 + $0x1], 1 }
0x1379   :  { %2621 = vsyncpa [#allocation8], 1 }
0x137a   :  { %2623 = vsyncpa [#allocation8 + $0x1], 1 }
0x137b   :  { %2624 = vsyncpa [#allocation11], 1 }
0x137c   :  { %2626 = vsyncpa [#allocation11 + $0x1], 1 }
0x137d   :  { %2627 = vsyncpa [#allocation6], 1 }
0x137e   :  { %2629 = vsyncpa [#allocation6 + $0x1], 1 }

</bundles_post_ra>
